<compile_context>
chip_gen: v7x
topology: tpu7x:2x2x1
jax: 0.10.0
libtpu: 0.0.40
codegen_flags: <defaults>
</compile_context>

<pallas_src>
import jax
import jax.numpy as jnp
from jax.experimental import pallas as pl
from jax.experimental.pallas import tpu as pltpu

# ----------------------------- configuration --------------------------------
INP = 4
HIDDEN = 8
OUP = 8
HDC = HIDDEN // 2          # ghost-module-1 primary channels
OPC = OUP // 2             # ghost-module-2 primary channels
H4 = HIDDEN // 4           # SE bottleneck width
B, H, W = 2, 16, 16
HW = H * W                 # 256 -> lane axis
CH = 8                     # padded channel count used inside the kernel
PAD_L = 128                # left halo of the depthwise scratch (lane-aligned)
PAD_W = 512                # total scratch width: 128 halo + 256 interior + 128 halo
BN_EPS = 1e-5

# Packed-weight column layout (single (8, 128) array, one DMA).
_PACK_LAYOUT = (('wsc1', 9), ('w1c', 9), ('w2c', 9),
                ('wsc2', CH), ('w1p', CH), ('w2p', CH), ('fc1w', CH), ('fc2w', CH),
                ('bsc1', 1), ('bsc2', 1), ('b1p', 1), ('b1c', 1),
                ('fc1b', 1), ('fc2b', 1), ('b2p', 1), ('b2c', 1))
W_OFF = {}
_off = 0
for _name, _w in _PACK_LAYOUT:
  W_OFF[_name] = (_off, _w)
  _off += _w
PACK_COLS = 128
assert _off <= PACK_COLS


# ------------------------------- the kernel ---------------------------------
def ghost_bottleneck_kernel(x_ref, wpk_ref, out_ref, pad_ref):
  """One batch element per grid step.  Layout: (channel, H*W) = (8, 256)."""
  f32 = jnp.float32
  relu = lambda t: jnp.maximum(t, 0.0)

  def wm(name):
    o, n = W_OFF[name]
    return wpk_ref[:, o:o + n]                       # (8, n) weight block

  # One-time setup per step: zero the depthwise halo scratch (interior gets
  # fully overwritten by every dw3x3 call; only the borders must be zero).
  pad_ref[...] = jnp.zeros((CH, PAD_W), f32)

  lane = jax.lax.broadcasted_iota(jnp.int32, (CH, HW), 1)
  colw = lane % W
  left_edge = colw == 0                              # invalid source for dx == -1
  right_edge = colw == W - 1                         # invalid source for dx == +1
  row_ch = jax.lax.broadcasted_iota(jnp.int32, (CH, HW), 0)
  low_half = row_ch < HDC                            # channel rows of the primary ghost branch

  def mac(wmat, v):
    # (8, 8) @ (8, N) as exact f32 broadcast-MACs on the VPU (K is only 8).
    acc = wmat[:, 0:1] * v[0:1, :]
    for ci in range(1, CH):
      acc = acc + wmat[:, ci:ci + 1] * v[ci:ci + 1, :]
    return acc

  def dw3x3(v, wtaps):
    # Depthwise 3x3, stride 1, SAME, on (8, H*W): the +-1 row/col shifts are
    # lane-offset window loads from the zero-haloed scratch row; only the
    # column (W) edges need masking -- row overflow lands in the zero halo.
    pad_ref[:, PAD_L:PAD_L + HW] = v                 # lane-aligned interior store
    acc = v * wtaps[:, 4:5]                          # centre tap (dy=0, dx=0)
    for dy in (-1, 0, 1):
      for dx in (-1, 0, 1):
        if dy == 0 and dx == 0:
          continue
        k = (dy + 1) * 3 + (dx + 1)
        start = PAD_L + dy * W + dx
        win = pad_ref[:, start:start + HW]
        if dx == -1:
          win = jnp.where(left_edge, 0.0, win)
        elif dx == 1:
          win = jnp.where(right_edge, 0.0, win)
        acc = acc + win * wtaps[:, k:k + 1]
    return acc

  xb = x_ref[0]                                      # (8, 256); rows INP: are zero

  # ---- ghost module 1 (ReLU); primary weights duplicated into both halves ----
  x1d = relu(mac(wm('w1p'), xb) + wm('b1p'))         # rows 0:4 == rows 4:8 == x1
  x2h = relu(dw3x3(x1d, wm('w1c')) + wm('b1c'))      # rows 4:8 == x2, rows 0:4 == 0
  xc = jnp.where(low_half, x1d, x2h)                 # == concat([x1, x2], channel)

  # ---- squeeze & excite (gate = clamp(fc2(relu(fc1(avgpool))), 0, 1)) ----
  pooled = jnp.sum(xc, axis=1, keepdims=True) * (1.0 / float(HW))   # (8, 1)
  f1 = relu(mac(wm('fc1w'), pooled) + wm('fc1b'))                   # (8, 1)
  gate = jnp.clip(mac(wm('fc2w'), f1) + wm('fc2b'), 0.0, 1.0)       # (8, 1)
  xse = xc * gate

  # ---- ghost module 2 (no ReLU) ----
  y1d = mac(wm('w2p'), xse) + wm('b2p')              # rows 0:4 == rows 4:8 == y1
  y2h = dw3x3(y1d, wm('w2c')) + wm('b2c')            # rows 4:8 == y2, rows 0:4 == 0
  ycat = jnp.where(low_half, y1d, y2h)               # == concat([y1, y2], channel)

  # ---- shortcut branch (opcut: inp != oup), computed last (short live range) ----
  r = relu(dw3x3(xb, wm('wsc1')) + wm('bsc1'))
  res = mac(wm('wsc2'), r) + wm('bsc2')

  out_ref[0] = ycat + res


# ----------------------- weight folding / packing ----------------------------
def _dw_block(w, s, place):
  # w: (c, 9) depthwise taps, s: (c,) folded BN scale -> (8, 9)
  wf = w * s[:, None]
  z = jnp.zeros((CH - wf.shape[0], 9), jnp.float32)
  return jnp.concatenate([wf, z], 0) if place == 'low' else jnp.concatenate([z, wf], 0)


def _mat_block(w, s=None, dup_rows=False):
  # w: (cout, cin) pointwise / FC weight -> (8, 8); BN scale folded on rows.
  wf = w if s is None else w * s[:, None]
  cout, cin = wf.shape
  if cin < CH:
    wf = jnp.concatenate([wf, jnp.zeros((cout, CH - cin), jnp.float32)], axis=1)
  if dup_rows:
    wf = jnp.concatenate([wf, wf], axis=0)
  elif cout < CH:
    wf = jnp.concatenate([wf, jnp.zeros((CH - cout, CH), jnp.float32)], axis=0)
  return wf


def _bias_block(b, place):
  bc = b[:, None].astype(jnp.float32)
  n = bc.shape[0]
  if place == 'full':
    return bc
  if place == 'dup':
    return jnp.concatenate([bc, bc], 0)
  z = jnp.zeros((CH - n, 1), jnp.float32)
  return jnp.concatenate([bc, z], 0) if place == 'low' else jnp.concatenate([z, bc], 0)


def fold_and_pack(p):
  """Fold BN scales into conv weights and pack everything into one (8,128) array."""
  blocks = {
      'wsc1': _dw_block(p['wsc1'], p['ssc1'], 'low'),
      'w1c': _dw_block(p['w1c'], p['s1c'], 'high'),
      'w2c': _dw_block(p['w2c'], p['s2c'], 'high'),
      'wsc2': _mat_block(p['wsc2'], p['ssc2']),
      'w1p': _mat_block(p['w1p'], p['s1p'], dup_rows=True),
      'w2p': _mat_block(p['w2p'], p['s2p'], dup_rows=True),
      'fc1w': _mat_block(p['fc1w']),
      'fc2w': _mat_block(p['fc2w']),
      'bsc1': _bias_block(p['bsc1'], 'low'),
      'bsc2': _bias_block(p['bsc2'], 'full'),
      'b1p': _bias_block(p['b1p'], 'dup'),
      'b1c': _bias_block(p['b1c'], 'high'),
      'fc1b': _bias_block(p['fc1b'], 'low'),
      'fc2b': _bias_block(p['fc2b'], 'full'),
      'b2p': _bias_block(p['b2p'], 'dup'),
      'b2c': _bias_block(p['b2c'], 'high'),
  }
  packed = jnp.concatenate([blocks[n] for n, _ in _PACK_LAYOUT], axis=1)
  pad = jnp.zeros((CH, PACK_COLS - packed.shape[1]), jnp.float32)
  return jnp.concatenate([packed, pad], axis=1)


# ------------------------------- wrapper -------------------------------------
def ghost_bottleneck(x_nchw, params):
  wpk = fold_and_pack(params)                                        # (8, 128)
  x = x_nchw.reshape(B, INP, HW)
  x = jnp.pad(x, ((0, 0), (0, CH - INP), (0, 0)))                    # (B, 8, 256)
  out = pl.pallas_call(
      ghost_bottleneck_kernel,
      out_shape=jax.ShapeDtypeStruct((B, CH, HW), jnp.float32),
      grid_spec=pltpu.PrefetchScalarGridSpec(
          num_scalar_prefetch=0,
          grid=(B,),
          in_specs=[
              pl.BlockSpec((1, CH, HW), lambda b: (b, 0, 0)),        # activations
              pl.BlockSpec((CH, PACK_COLS), lambda b: (0, 0)),       # packed weights
          ],
          out_specs=pl.BlockSpec((1, CH, HW), lambda b: (b, 0, 0)),  # lane-dense output
          scratch_shapes=[
              pltpu.VMEM((CH, PAD_W), jnp.float32),                  # dw-conv halo row
          ]),
      compiler_params=pltpu.CompilerParams(
          dimension_semantics=("parallel",)),                        # 2 TCs on v7x
  )(x, wpk)
  return out.reshape(B, OUP, H, W)


# ----------------------- deterministic parameter init ------------------------
def init_params(key):
  ks = list(jax.random.split(key, 64))
  it = iter(range(64))

  def nrm(shape, scale=0.2):
    return scale * jax.random.normal(ks[next(it)], shape, jnp.float32)

  def bn(c):
    gamma = 1.0 + 0.1 * jax.random.normal(ks[next(it)], (c,), jnp.float32)
    beta = 0.1 * jax.random.normal(ks[next(it)], (c,), jnp.float32)
    mean = 0.1 * jax.random.normal(ks[next(it)], (c,), jnp.float32)
    var = 0.5 + jax.random.uniform(ks[next(it)], (c,), jnp.float32)
    scale = gamma / jnp.sqrt(var + BN_EPS)
    bias = beta - mean * scale
    return scale, bias

  p = {}
  p['wsc1'] = nrm((INP, 9))                     # conv_sc1 (depthwise 3x3 on inp)
  p['ssc1'], p['bsc1'] = bn(INP)                # bn_sc1
  p['wsc2'] = nrm((OUP, INP))                   # conv_sc2 (1x1 inp->oup)
  p['ssc2'], p['bsc2'] = bn(OUP)                # bn_sc2
  p['w1p'] = nrm((HDC, INP))                    # conv1p (1x1 inp->hdc)
  p['s1p'], p['b1p'] = bn(HDC)                  # bn1p
  p['w1c'] = nrm((HDC, 9))                      # conv1c (depthwise 3x3 on hdc)
  p['s1c'], p['b1c'] = bn(HDC)                  # bn1c
  p['fc1w'] = nrm((H4, HIDDEN))                 # fc1 (hidden -> hidden//4)
  p['fc1b'] = nrm((H4,), 0.05)
  p['fc2w'] = nrm((HIDDEN, H4))                 # fc2 (hidden//4 -> hidden)
  p['fc2b'] = nrm((HIDDEN,), 0.05)
  p['w2p'] = nrm((OPC, HIDDEN))                 # conv2p (1x1 hidden->opc)
  p['s2p'], p['b2p'] = bn(OPC)                  # bn2p
  p['w2c'] = nrm((OPC, 9))                      # conv2c (depthwise 3x3 on opc)
  p['s2c'], p['b2c'] = bn(OPC)                  # bn2c
  return p


# -------------------------- pure-JAX reference (NCHW) ------------------------
def ref_forward(x, p):
  relu = lambda t: jnp.maximum(t, 0.0)
  hp = jax.lax.Precision.HIGHEST

  def dwconv(v, w):      # w: (C, 9) -> OIHW (C, 1, 3, 3), grouped
    filt = w.reshape(-1, 1, 3, 3)
    return jax.lax.conv_general_dilated(
        v, filt, (1, 1), 'SAME',
        dimension_numbers=('NCHW', 'OIHW', 'NCHW'),
        feature_group_count=v.shape[1], precision=hp)

  def pwconv(v, w):      # w: (Cout, Cin)
    return jax.lax.conv_general_dilated(
        v, w[:, :, None, None], (1, 1), 'SAME',
        dimension_numbers=('NCHW', 'OIHW', 'NCHW'), precision=hp)

  def bnorm(v, s, b):
    return v * s[None, :, None, None] + b[None, :, None, None]

  res = relu(bnorm(dwconv(x, p['wsc1']), p['ssc1'], p['bsc1']))
  res = bnorm(pwconv(res, p['wsc2']), p['ssc2'], p['bsc2'])
  x1 = relu(bnorm(pwconv(x, p['w1p']), p['s1p'], p['b1p']))
  x2 = relu(bnorm(dwconv(x1, p['w1c']), p['s1c'], p['b1c']))
  xc = jnp.concatenate([x1, x2], axis=1)
  pooled = jnp.mean(xc, axis=(2, 3))
  f = relu(jnp.dot(pooled, p['fc1w'].T, precision=hp) + p['fc1b'])
  f = jnp.dot(f, p['fc2w'].T, precision=hp) + p['fc2b']
  f = jnp.clip(f, 0.0, 1.0)
  xse = xc * f[:, :, None, None]
  y1 = bnorm(pwconv(xse, p['w2p']), p['s2p'], p['b2p'])
  y2 = bnorm(dwconv(y1, p['w2c']), p['s2c'], p['b2c'])
  return jnp.concatenate([y1, y2], axis=1) + res


# --------------------------------- main ---------------------------------------
if __name__ == "__main__":
  key = jax.random.PRNGKey(0)
  kx, kp = jax.random.split(key)

  # PyTorch-layout input (NCHW); the wrapper handles all layout plumbing.
  x_nchw = jax.random.normal(kx, (B, INP, H, W), jnp.float32)
  params = init_params(kp)

  out = jax.block_until_ready(ghost_bottleneck(x_nchw, params))
  ref = jax.block_until_ready(ref_forward(x_nchw, params))

  assert out.shape == (B, OUP, H, W), out.shape
  max_err = float(jnp.max(jnp.abs(out - ref)))
  assert max_err < 1e-3, f"max abs err = {max_err}"
  print("KERNEL_OK")
</pallas_src>

<mosaic_0001>
module attributes {stable_mosaic.version = 11 : i64} {
  func.func @ghost_bottleneck_kernel(%arg0: i32, %arg1: memref<1x8x256xf32, #tpu.memory_space<vmem>>, %arg2: memref<8x128xf32, #tpu.memory_space<vmem>>, %arg3: memref<1x8x256xf32, #tpu.memory_space<vmem>>, %arg4: memref<8x512xf32, #tpu.memory_space<vmem>>) attributes {dimension_semantics = [#tpu.dimension_semantics<parallel>], iteration_bounds = array<i64: 2>, scalar_prefetch = 0 : i64, scratch_operands = 1 : i64, tpu.core_type = #tpu.core_type<tc>, window_params = [{transform_indices = @transform_0, window_bounds = array<i64: 1, 8, 256>}, {pipeline_mode = #tpu.pipeline_mode<synchronous>, transform_indices = @transform_1, window_bounds = array<i64: 8, 128>}, {transform_indices = @transform_2, window_bounds = array<i64: 1, 8, 256>}]} {
    %cst = arith.constant 0.000000e+00 : f32
    %0 = vector.broadcast %cst : f32 to vector<8x512xf32>
    %c0 = arith.constant 0 : index
    %c0_0 = arith.constant 0 : index
    %1 = vector.load %arg4[%c0, %c0_0] : memref<8x512xf32, #tpu.memory_space<vmem>>, vector<8x512xf32>
    tpu.vector_store %arg4[%c0, %c0_0], %0 {strides = array<i32>} : memref<8x512xf32, #tpu.memory_space<vmem>>, vector<8x512xf32>,
    %2 = tpu.iota {dimensions = array<i32: 1>} : vector<8x256xi32>
    %c16_i32 = arith.constant 16 : i32
    %c0_i32 = arith.constant 0 : i32
    %3 = arith.cmpi eq, %c16_i32, %c0_i32 : i32
    %c1_i32 = arith.constant 1 : i32
    %4 = arith.select %3, %c1_i32, %c16_i32 : i32
    %5 = vector.broadcast %4 : i32 to vector<8x256xi32>
    %6 = arith.remsi %2, %5 : vector<8x256xi32>
    %c0_i32_1 = arith.constant 0 : i32
    %7 = vector.broadcast %c0_i32_1 : i32 to vector<8x256xi32>
    %8 = arith.cmpi ne, %6, %7 : vector<8x256xi32>
    %c0_i32_2 = arith.constant 0 : i32
    %9 = vector.broadcast %c0_i32_2 : i32 to vector<8x256xi32>
    %10 = arith.cmpi slt, %6, %9 : vector<8x256xi32>
    %c0_i32_3 = arith.constant 0 : i32
    %11 = arith.cmpi slt, %4, %c0_i32_3 : i32
    %12 = vector.broadcast %11 : i1 to vector<8x256xi1>
    %13 = vector.broadcast %12 : vector<8x256xi1> to vector<8x256xi1>
    %14 = arith.xori %10, %13 : vector<8x256xi1>
    %15 = arith.andi %14, %8 : vector<8x256xi1>
    %16 = vector.broadcast %4 : i32 to vector<8x256xi32>
    %17 = arith.addi %6, %16 : vector<8x256xi32>
    %18 = arith.select %15, %17, %6 : vector<8x256xi1>, vector<8x256xi32>
    %c0_i32_4 = arith.constant 0 : i32
    %19 = vector.broadcast %c0_i32_4 : i32 to vector<8x256xi32>
    %20 = arith.cmpi eq, %18, %19 : vector<8x256xi32>
    %c15_i32 = arith.constant 15 : i32
    %21 = vector.broadcast %c15_i32 : i32 to vector<8x256xi32>
    %22 = arith.cmpi eq, %18, %21 : vector<8x256xi32>
    %23 = tpu.iota {dimensions = array<i32: 0>} : vector<8x256xi32>
    %c4_i32 = arith.constant 4 : i32
    %24 = vector.broadcast %c4_i32 : i32 to vector<8x256xi32>
    %25 = arith.cmpi slt, %23, %24 : vector<8x256xi32>
    %c0_5 = arith.constant 0 : index
    %c0_6 = arith.constant 0 : index
    %c0_7 = arith.constant 0 : index
    %26 = vector.load %arg1[%c0_5, %c0_6, %c0_7] : memref<1x8x256xf32, #tpu.memory_space<vmem>>, vector<1x8x256xf32>
    %27 = vector.shape_cast %26 : vector<1x8x256xf32> to vector<8x256xf32>
    %c0_8 = arith.constant 0 : index
    %c35 = arith.constant 35 : index
    %28 = vector.load %arg2[%c0_8, %c35] : memref<8x128xf32, #tpu.memory_space<vmem>>, vector<8x8xf32>
    %29 = vector.extract_strided_slice %28 {offsets = [0, 0], sizes = [8, 1], strides = [1, 1]} : vector<8x8xf32> to vector<8x1xf32>
    %30 = vector.extract_strided_slice %27 {offsets = [0, 0], sizes = [1, 256], strides = [1, 1]} : vector<8x256xf32> to vector<1x256xf32>
    %31 = vector.broadcast %29 : vector<8x1xf32> to vector<8x256xf32>
    %32 = vector.broadcast %30 : vector<1x256xf32> to vector<8x256xf32>
    %33 = arith.mulf %31, %32 : vector<8x256xf32>
    %34 = vector.extract_strided_slice %28 {offsets = [0, 1], sizes = [8, 1], strides = [1, 1]} : vector<8x8xf32> to vector<8x1xf32>
    %35 = vector.extract_strided_slice %27 {offsets = [1, 0], sizes = [1, 256], strides = [1, 1]} : vector<8x256xf32> to vector<1x256xf32>
    %36 = vector.broadcast %34 : vector<8x1xf32> to vector<8x256xf32>
    %37 = vector.broadcast %35 : vector<1x256xf32> to vector<8x256xf32>
    %38 = arith.mulf %36, %37 : vector<8x256xf32>
    %39 = arith.addf %33, %38 : vector<8x256xf32>
    %40 = vector.extract_strided_slice %28 {offsets = [0, 2], sizes = [8, 1], strides = [1, 1]} : vector<8x8xf32> to vector<8x1xf32>
    %41 = vector.extract_strided_slice %27 {offsets = [2, 0], sizes = [1, 256], strides = [1, 1]} : vector<8x256xf32> to vector<1x256xf32>
    %42 = vector.broadcast %40 : vector<8x1xf32> to vector<8x256xf32>
    %43 = vector.broadcast %41 : vector<1x256xf32> to vector<8x256xf32>
    %44 = arith.mulf %42, %43 : vector<8x256xf32>
    %45 = arith.addf %39, %44 : vector<8x256xf32>
    %46 = vector.extract_strided_slice %28 {offsets = [0, 3], sizes = [8, 1], strides = [1, 1]} : vector<8x8xf32> to vector<8x1xf32>
    %47 = vector.extract_strided_slice %27 {offsets = [3, 0], sizes = [1, 256], strides = [1, 1]} : vector<8x256xf32> to vector<1x256xf32>
    %48 = vector.broadcast %46 : vector<8x1xf32> to vector<8x256xf32>
    %49 = vector.broadcast %47 : vector<1x256xf32> to vector<8x256xf32>
    %50 = arith.mulf %48, %49 : vector<8x256xf32>
    %51 = arith.addf %45, %50 : vector<8x256xf32>
    %52 = vector.extract_strided_slice %28 {offsets = [0, 4], sizes = [8, 1], strides = [1, 1]} : vector<8x8xf32> to vector<8x1xf32>
    %53 = vector.extract_strided_slice %27 {offsets = [4, 0], sizes = [1, 256], strides = [1, 1]} : vector<8x256xf32> to vector<1x256xf32>
    %54 = vector.broadcast %52 : vector<8x1xf32> to vector<8x256xf32>
    %55 = vector.broadcast %53 : vector<1x256xf32> to vector<8x256xf32>
    %56 = arith.mulf %54, %55 : vector<8x256xf32>
    %57 = arith.addf %51, %56 : vector<8x256xf32>
    %58 = vector.extract_strided_slice %28 {offsets = [0, 5], sizes = [8, 1], strides = [1, 1]} : vector<8x8xf32> to vector<8x1xf32>
    %59 = vector.extract_strided_slice %27 {offsets = [5, 0], sizes = [1, 256], strides = [1, 1]} : vector<8x256xf32> to vector<1x256xf32>
    %60 = vector.broadcast %58 : vector<8x1xf32> to vector<8x256xf32>
    %61 = vector.broadcast %59 : vector<1x256xf32> to vector<8x256xf32>
    %62 = arith.mulf %60, %61 : vector<8x256xf32>
    %63 = arith.addf %57, %62 : vector<8x256xf32>
    %64 = vector.extract_strided_slice %28 {offsets = [0, 6], sizes = [8, 1], strides = [1, 1]} : vector<8x8xf32> to vector<8x1xf32>
    %65 = vector.extract_strided_slice %27 {offsets = [6, 0], sizes = [1, 256], strides = [1, 1]} : vector<8x256xf32> to vector<1x256xf32>
    %66 = vector.broadcast %64 : vector<8x1xf32> to vector<8x256xf32>
    %67 = vector.broadcast %65 : vector<1x256xf32> to vector<8x256xf32>
    %68 = arith.mulf %66, %67 : vector<8x256xf32>
    %69 = arith.addf %63, %68 : vector<8x256xf32>
    %70 = vector.extract_strided_slice %28 {offsets = [0, 7], sizes = [8, 1], strides = [1, 1]} : vector<8x8xf32> to vector<8x1xf32>
    %71 = vector.extract_strided_slice %27 {offsets = [7, 0], sizes = [1, 256], strides = [1, 1]} : vector<8x256xf32> to vector<1x256xf32>
    %72 = vector.broadcast %70 : vector<8x1xf32> to vector<8x256xf32>
    %73 = vector.broadcast %71 : vector<1x256xf32> to vector<8x256xf32>
    %74 = arith.mulf %72, %73 : vector<8x256xf32>
    %75 = arith.addf %69, %74 : vector<8x256xf32>
    %c0_9 = arith.constant 0 : index
    %c69 = arith.constant 69 : index
    %76 = vector.load %arg2[%c0_9, %c69] : memref<8x128xf32, #tpu.memory_space<vmem>>, vector<8x1xf32>
    %77 = vector.broadcast %76 : vector<8x1xf32> to vector<8x256xf32>
    %78 = arith.addf %75, %77 : vector<8x256xf32>
    %cst_10 = arith.constant 0.000000e+00 : f32
    %79 = vector.broadcast %cst_10 : f32 to vector<8x256xf32>
    %80 = arith.maximumf %78, %79 : vector<8x256xf32>
    %c0_11 = arith.constant 0 : index
    %c9 = arith.constant 9 : index
    %81 = vector.load %arg2[%c0_11, %c9] : memref<8x128xf32, #tpu.memory_space<vmem>>, vector<8x9xf32>
    %c0_12 = arith.constant 0 : index
    %c128 = arith.constant 128 : index
    %82 = vector.load %arg4[%c0_12, %c128] : memref<8x512xf32, #tpu.memory_space<vmem>>, vector<8x256xf32>
    tpu.vector_store %arg4[%c0_12, %c128], %80 {strides = array<i32>} : memref<8x512xf32, #tpu.memory_space<vmem>>, vector<8x256xf32>,
    %83 = vector.extract_strided_slice %81 {offsets = [0, 4], sizes = [8, 1], strides = [1, 1]} : vector<8x9xf32> to vector<8x1xf32>
    %84 = vector.broadcast %83 : vector<8x1xf32> to vector<8x256xf32>
    %85 = arith.mulf %80, %84 : vector<8x256xf32>
    %c0_13 = arith.constant 0 : index
    %c111 = arith.constant 111 : index
    %86 = vector.load %arg4[%c0_13, %c111] : memref<8x512xf32, #tpu.memory_space<vmem>>, vector<8x256xf32>
    %cst_14 = arith.constant 0.000000e+00 : f32
    %87 = vector.broadcast %cst_14 : f32 to vector<8x256xf32>
    %88 = arith.select %20, %87, %86 : vector<8x256xi1>, vector<8x256xf32>
    %89 = vector.extract_strided_slice %81 {offsets = [0, 0], sizes = [8, 1], strides = [1, 1]} : vector<8x9xf32> to vector<8x1xf32>
    %90 = vector.broadcast %89 : vector<8x1xf32> to vector<8x256xf32>
    %91 = arith.mulf %88, %90 : vector<8x256xf32>
    %92 = arith.addf %85, %91 : vector<8x256xf32>
    %c0_15 = arith.constant 0 : index
    %c112 = arith.constant 112 : index
    %93 = vector.load %arg4[%c0_15, %c112] : memref<8x512xf32, #tpu.memory_space<vmem>>, vector<8x256xf32>
    %94 = vector.extract_strided_slice %81 {offsets = [0, 1], sizes = [8, 1], strides = [1, 1]} : vector<8x9xf32> to vector<8x1xf32>
    %95 = vector.broadcast %94 : vector<8x1xf32> to vector<8x256xf32>
    %96 = arith.mulf %93, %95 : vector<8x256xf32>
    %97 = arith.addf %92, %96 : vector<8x256xf32>
    %c0_16 = arith.constant 0 : index
    %c113 = arith.constant 113 : index
    %98 = vector.load %arg4[%c0_16, %c113] : memref<8x512xf32, #tpu.memory_space<vmem>>, vector<8x256xf32>
    %cst_17 = arith.constant 0.000000e+00 : f32
    %99 = vector.broadcast %cst_17 : f32 to vector<8x256xf32>
    %100 = arith.select %22, %99, %98 : vector<8x256xi1>, vector<8x256xf32>
    %101 = vector.extract_strided_slice %81 {offsets = [0, 2], sizes = [8, 1], strides = [1, 1]} : vector<8x9xf32> to vector<8x1xf32>
    %102 = vector.broadcast %101 : vector<8x1xf32> to vector<8x256xf32>
    %103 = arith.mulf %100, %102 : vector<8x256xf32>
    %104 = arith.addf %97, %103 : vector<8x256xf32>
    %c0_18 = arith.constant 0 : index
    %c127 = arith.constant 127 : index
    %105 = vector.load %arg4[%c0_18, %c127] : memref<8x512xf32, #tpu.memory_space<vmem>>, vector<8x256xf32>
    %cst_19 = arith.constant 0.000000e+00 : f32
    %106 = vector.broadcast %cst_19 : f32 to vector<8x256xf32>
    %107 = arith.select %20, %106, %105 : vector<8x256xi1>, vector<8x256xf32>
    %108 = vector.extract_strided_slice %81 {offsets = [0, 3], sizes = [8, 1], strides = [1, 1]} : vector<8x9xf32> to vector<8x1xf32>
    %109 = vector.broadcast %108 : vector<8x1xf32> to vector<8x256xf32>
    %110 = arith.mulf %107, %109 : vector<8x256xf32>
    %111 = arith.addf %104, %110 : vector<8x256xf32>
    %c0_20 = arith.constant 0 : index
    %c129 = arith.constant 129 : index
    %112 = vector.load %arg4[%c0_20, %c129] : memref<8x512xf32, #tpu.memory_space<vmem>>, vector<8x256xf32>
    %cst_21 = arith.constant 0.000000e+00 : f32
    %113 = vector.broadcast %cst_21 : f32 to vector<8x256xf32>
    %114 = arith.select %22, %113, %112 : vector<8x256xi1>, vector<8x256xf32>
    %115 = vector.extract_strided_slice %81 {offsets = [0, 5], sizes = [8, 1], strides = [1, 1]} : vector<8x9xf32> to vector<8x1xf32>
    %116 = vector.broadcast %115 : vector<8x1xf32> to vector<8x256xf32>
    %117 = arith.mulf %114, %116 : vector<8x256xf32>
    %118 = arith.addf %111, %117 : vector<8x256xf32>
    %c0_22 = arith.constant 0 : index
    %c143 = arith.constant 143 : index
    %119 = vector.load %arg4[%c0_22, %c143] : memref<8x512xf32, #tpu.memory_space<vmem>>, vector<8x256xf32>
    %cst_23 = arith.constant 0.000000e+00 : f32
    %120 = vector.broadcast %cst_23 : f32 to vector<8x256xf32>
    %121 = arith.select %20, %120, %119 : vector<8x256xi1>, vector<8x256xf32>
    %122 = vector.extract_strided_slice %81 {offsets = [0, 6], sizes = [8, 1], strides = [1, 1]} : vector<8x9xf32> to vector<8x1xf32>
    %123 = vector.broadcast %122 : vector<8x1xf32> to vector<8x256xf32>
    %124 = arith.mulf %121, %123 : vector<8x256xf32>
    %125 = arith.addf %118, %124 : vector<8x256xf32>
    %c0_24 = arith.constant 0 : index
    %c144 = arith.constant 144 : index
    %126 = vector.load %arg4[%c0_24, %c144] : memref<8x512xf32, #tpu.memory_space<vmem>>, vector<8x256xf32>
    %127 = vector.extract_strided_slice %81 {offsets = [0, 7], sizes = [8, 1], strides = [1, 1]} : vector<8x9xf32> to vector<8x1xf32>
    %128 = vector.broadcast %127 : vector<8x1xf32> to vector<8x256xf32>
    %129 = arith.mulf %126, %128 : vector<8x256xf32>
    %130 = arith.addf %125, %129 : vector<8x256xf32>
    %c0_25 = arith.constant 0 : index
    %c145 = arith.constant 145 : index
    %131 = vector.load %arg4[%c0_25, %c145] : memref<8x512xf32, #tpu.memory_space<vmem>>, vector<8x256xf32>
    %cst_26 = arith.constant 0.000000e+00 : f32
    %132 = vector.broadcast %cst_26 : f32 to vector<8x256xf32>
    %133 = arith.select %22, %132, %131 : vector<8x256xi1>, vector<8x256xf32>
    %134 = vector.extract_strided_slice %81 {offsets = [0, 8], sizes = [8, 1], strides = [1, 1]} : vector<8x9xf32> to vector<8x1xf32>
    %135 = vector.broadcast %134 : vector<8x1xf32> to vector<8x256xf32>
    %136 = arith.mulf %133, %135 : vector<8x256xf32>
    %137 = arith.addf %130, %136 : vector<8x256xf32>
    %c0_27 = arith.constant 0 : index
    %c70 = arith.constant 70 : index
    %138 = vector.load %arg2[%c0_27, %c70] : memref<8x128xf32, #tpu.memory_space<vmem>>, vector<8x1xf32>
    %139 = vector.broadcast %138 : vector<8x1xf32> to vector<8x256xf32>
    %140 = arith.addf %137, %139 : vector<8x256xf32>
    %cst_28 = arith.constant 0.000000e+00 : f32
    %141 = vector.broadcast %cst_28 : f32 to vector<8x256xf32>
    %142 = arith.maximumf %140, %141 : vector<8x256xf32>
    %143 = arith.select %25, %80, %142 : vector<8x256xi1>, vector<8x256xf32>
    %cst_29 = arith.constant dense<0.000000e+00> : vector<8xf32>
    %144 = vector.multi_reduction <add>, %143, %cst_29 [1] : vector<8x256xf32> to vector<8xf32>
    %145 = vector.shape_cast %144 : vector<8xf32> to vector<8x1xf32>
    %cst_30 = arith.constant 3.906250e-03 : f32
    %146 = vector.broadcast %cst_30 : f32 to vector<8x1xf32>
    %147 = arith.mulf %145, %146 : vector<8x1xf32>
    %c0_31 = arith.constant 0 : index
    %c51 = arith.constant 51 : index
    %148 = vector.load %arg2[%c0_31, %c51] : memref<8x128xf32, #tpu.memory_space<vmem>>, vector<8x8xf32>
    %149 = vector.extract_strided_slice %148 {offsets = [0, 0], sizes = [8, 1], strides = [1, 1]} : vector<8x8xf32> to vector<8x1xf32>
    %150 = vector.extract_strided_slice %147 {offsets = [0, 0], sizes = [1, 1], strides = [1, 1]} : vector<8x1xf32> to vector<1x1xf32>
    %151 = vector.broadcast %150 : vector<1x1xf32> to vector<8x1xf32>
    %152 = arith.mulf %149, %151 : vector<8x1xf32>
    %153 = vector.extract_strided_slice %148 {offsets = [0, 1], sizes = [8, 1], strides = [1, 1]} : vector<8x8xf32> to vector<8x1xf32>
    %154 = vector.extract_strided_slice %147 {offsets = [1, 0], sizes = [1, 1], strides = [1, 1]} : vector<8x1xf32> to vector<1x1xf32>
    %155 = vector.broadcast %154 : vector<1x1xf32> to vector<8x1xf32>
    %156 = arith.mulf %153, %155 : vector<8x1xf32>
    %157 = arith.addf %152, %156 : vector<8x1xf32>
    %158 = vector.extract_strided_slice %148 {offsets = [0, 2], sizes = [8, 1], strides = [1, 1]} : vector<8x8xf32> to vector<8x1xf32>
    %159 = vector.extract_strided_slice %147 {offsets = [2, 0], sizes = [1, 1], strides = [1, 1]} : vector<8x1xf32> to vector<1x1xf32>
    %160 = vector.broadcast %159 : vector<1x1xf32> to vector<8x1xf32>
    %161 = arith.mulf %158, %160 : vector<8x1xf32>
    %162 = arith.addf %157, %161 : vector<8x1xf32>
    %163 = vector.extract_strided_slice %148 {offsets = [0, 3], sizes = [8, 1], strides = [1, 1]} : vector<8x8xf32> to vector<8x1xf32>
    %164 = vector.extract_strided_slice %147 {offsets = [3, 0], sizes = [1, 1], strides = [1, 1]} : vector<8x1xf32> to vector<1x1xf32>
    %165 = vector.broadcast %164 : vector<1x1xf32> to vector<8x1xf32>
    %166 = arith.mulf %163, %165 : vector<8x1xf32>
    %167 = arith.addf %162, %166 : vector<8x1xf32>
    %168 = vector.extract_strided_slice %148 {offsets = [0, 4], sizes = [8, 1], strides = [1, 1]} : vector<8x8xf32> to vector<8x1xf32>
    %169 = vector.extract_strided_slice %147 {offsets = [4, 0], sizes = [1, 1], strides = [1, 1]} : vector<8x1xf32> to vector<1x1xf32>
    %170 = vector.broadcast %169 : vector<1x1xf32> to vector<8x1xf32>
    %171 = arith.mulf %168, %170 : vector<8x1xf32>
    %172 = arith.addf %167, %171 : vector<8x1xf32>
    %173 = vector.extract_strided_slice %148 {offsets = [0, 5], sizes = [8, 1], strides = [1, 1]} : vector<8x8xf32> to vector<8x1xf32>
    %174 = vector.extract_strided_slice %147 {offsets = [5, 0], sizes = [1, 1], strides = [1, 1]} : vector<8x1xf32> to vector<1x1xf32>
    %175 = vector.broadcast %174 : vector<1x1xf32> to vector<8x1xf32>
    %176 = arith.mulf %173, %175 : vector<8x1xf32>
    %177 = arith.addf %172, %176 : vector<8x1xf32>
    %178 = vector.extract_strided_slice %148 {offsets = [0, 6], sizes = [8, 1], strides = [1, 1]} : vector<8x8xf32> to vector<8x1xf32>
    %179 = vector.extract_strided_slice %147 {offsets = [6, 0], sizes = [1, 1], strides = [1, 1]} : vector<8x1xf32> to vector<1x1xf32>
    %180 = vector.broadcast %179 : vector<1x1xf32> to vector<8x1xf32>
    %181 = arith.mulf %178, %180 : vector<8x1xf32>
    %182 = arith.addf %177, %181 : vector<8x1xf32>
    %183 = vector.extract_strided_slice %148 {offsets = [0, 7], sizes = [8, 1], strides = [1, 1]} : vector<8x8xf32> to vector<8x1xf32>
    %184 = vector.extract_strided_slice %147 {offsets = [7, 0], sizes = [1, 1], strides = [1, 1]} : vector<8x1xf32> to vector<1x1xf32>
    %185 = vector.broadcast %184 : vector<1x1xf32> to vector<8x1xf32>
    %186 = arith.mulf %183, %185 : vector<8x1xf32>
    %187 = arith.addf %182, %186 : vector<8x1xf32>
    %c0_32 = arith.constant 0 : index
    %c71 = arith.constant 71 : index
    %188 = vector.load %arg2[%c0_32, %c71] : memref<8x128xf32, #tpu.memory_space<vmem>>, vector<8x1xf32>
    %189 = arith.addf %187, %188 : vector<8x1xf32>
    %cst_33 = arith.constant 0.000000e+00 : f32
    %190 = vector.broadcast %cst_33 : f32 to vector<8x1xf32>
    %191 = arith.maximumf %189, %190 : vector<8x1xf32>
    %c0_34 = arith.constant 0 : index
    %c59 = arith.constant 59 : index
    %192 = vector.load %arg2[%c0_34, %c59] : memref<8x128xf32, #tpu.memory_space<vmem>>, vector<8x8xf32>
    %193 = vector.extract_strided_slice %192 {offsets = [0, 0], sizes = [8, 1], strides = [1, 1]} : vector<8x8xf32> to vector<8x1xf32>
    %194 = vector.extract_strided_slice %191 {offsets = [0, 0], sizes = [1, 1], strides = [1, 1]} : vector<8x1xf32> to vector<1x1xf32>
    %195 = vector.broadcast %194 : vector<1x1xf32> to vector<8x1xf32>
    %196 = arith.mulf %193, %195 : vector<8x1xf32>
    %197 = vector.extract_strided_slice %192 {offsets = [0, 1], sizes = [8, 1], strides = [1, 1]} : vector<8x8xf32> to vector<8x1xf32>
    %198 = vector.extract_strided_slice %191 {offsets = [1, 0], sizes = [1, 1], strides = [1, 1]} : vector<8x1xf32> to vector<1x1xf32>
    %199 = vector.broadcast %198 : vector<1x1xf32> to vector<8x1xf32>
    %200 = arith.mulf %197, %199 : vector<8x1xf32>
    %201 = arith.addf %196, %200 : vector<8x1xf32>
    %202 = vector.extract_strided_slice %192 {offsets = [0, 2], sizes = [8, 1], strides = [1, 1]} : vector<8x8xf32> to vector<8x1xf32>
    %203 = vector.extract_strided_slice %191 {offsets = [2, 0], sizes = [1, 1], strides = [1, 1]} : vector<8x1xf32> to vector<1x1xf32>
    %204 = vector.broadcast %203 : vector<1x1xf32> to vector<8x1xf32>
    %205 = arith.mulf %202, %204 : vector<8x1xf32>
    %206 = arith.addf %201, %205 : vector<8x1xf32>
    %207 = vector.extract_strided_slice %192 {offsets = [0, 3], sizes = [8, 1], strides = [1, 1]} : vector<8x8xf32> to vector<8x1xf32>
    %208 = vector.extract_strided_slice %191 {offsets = [3, 0], sizes = [1, 1], strides = [1, 1]} : vector<8x1xf32> to vector<1x1xf32>
    %209 = vector.broadcast %208 : vector<1x1xf32> to vector<8x1xf32>
    %210 = arith.mulf %207, %209 : vector<8x1xf32>
    %211 = arith.addf %206, %210 : vector<8x1xf32>
    %212 = vector.extract_strided_slice %192 {offsets = [0, 4], sizes = [8, 1], strides = [1, 1]} : vector<8x8xf32> to vector<8x1xf32>
    %213 = vector.extract_strided_slice %191 {offsets = [4, 0], sizes = [1, 1], strides = [1, 1]} : vector<8x1xf32> to vector<1x1xf32>
    %214 = vector.broadcast %213 : vector<1x1xf32> to vector<8x1xf32>
    %215 = arith.mulf %212, %214 : vector<8x1xf32>
    %216 = arith.addf %211, %215 : vector<8x1xf32>
    %217 = vector.extract_strided_slice %192 {offsets = [0, 5], sizes = [8, 1], strides = [1, 1]} : vector<8x8xf32> to vector<8x1xf32>
    %218 = vector.extract_strided_slice %191 {offsets = [5, 0], sizes = [1, 1], strides = [1, 1]} : vector<8x1xf32> to vector<1x1xf32>
    %219 = vector.broadcast %218 : vector<1x1xf32> to vector<8x1xf32>
    %220 = arith.mulf %217, %219 : vector<8x1xf32>
    %221 = arith.addf %216, %220 : vector<8x1xf32>
    %222 = vector.extract_strided_slice %192 {offsets = [0, 6], sizes = [8, 1], strides = [1, 1]} : vector<8x8xf32> to vector<8x1xf32>
    %223 = vector.extract_strided_slice %191 {offsets = [6, 0], sizes = [1, 1], strides = [1, 1]} : vector<8x1xf32> to vector<1x1xf32>
    %224 = vector.broadcast %223 : vector<1x1xf32> to vector<8x1xf32>
    %225 = arith.mulf %222, %224 : vector<8x1xf32>
    %226 = arith.addf %221, %225 : vector<8x1xf32>
    %227 = vector.extract_strided_slice %192 {offsets = [0, 7], sizes = [8, 1], strides = [1, 1]} : vector<8x8xf32> to vector<8x1xf32>
    %228 = vector.extract_strided_slice %191 {offsets = [7, 0], sizes = [1, 1], strides = [1, 1]} : vector<8x1xf32> to vector<1x1xf32>
    %229 = vector.broadcast %228 : vector<1x1xf32> to vector<8x1xf32>
    %230 = arith.mulf %227, %229 : vector<8x1xf32>
    %231 = arith.addf %226, %230 : vector<8x1xf32>
    %c0_35 = arith.constant 0 : index
    %c72 = arith.constant 72 : index
    %232 = vector.load %arg2[%c0_35, %c72] : memref<8x128xf32, #tpu.memory_space<vmem>>, vector<8x1xf32>
    %233 = arith.addf %231, %232 : vector<8x1xf32>
    %cst_36 = arith.constant 0.000000e+00 : f32
    %cst_37 = arith.constant 1.000000e+00 : f32
    %234 = vector.broadcast %cst_36 : f32 to vector<8x1xf32>
    %235 = arith.maximumf %234, %233 : vector<8x1xf32>
    %236 = vector.broadcast %cst_37 : f32 to vector<8x1xf32>
    %237 = arith.minimumf %236, %235 : vector<8x1xf32>
    %238 = vector.broadcast %237 : vector<8x1xf32> to vector<8x256xf32>
    %239 = arith.mulf %143, %238 : vector<8x256xf32>
    %c0_38 = arith.constant 0 : index
    %c43 = arith.constant 43 : index
    %240 = vector.load %arg2[%c0_38, %c43] : memref<8x128xf32, #tpu.memory_space<vmem>>, vector<8x8xf32>
    %241 = vector.extract_strided_slice %240 {offsets = [0, 0], sizes = [8, 1], strides = [1, 1]} : vector<8x8xf32> to vector<8x1xf32>
    %242 = vector.extract_strided_slice %239 {offsets = [0, 0], sizes = [1, 256], strides = [1, 1]} : vector<8x256xf32> to vector<1x256xf32>
    %243 = vector.broadcast %241 : vector<8x1xf32> to vector<8x256xf32>
    %244 = vector.broadcast %242 : vector<1x256xf32> to vector<8x256xf32>
    %245 = arith.mulf %243, %244 : vector<8x256xf32>
    %246 = vector.extract_strided_slice %240 {offsets = [0, 1], sizes = [8, 1], strides = [1, 1]} : vector<8x8xf32> to vector<8x1xf32>
    %247 = vector.extract_strided_slice %239 {offsets = [1, 0], sizes = [1, 256], strides = [1, 1]} : vector<8x256xf32> to vector<1x256xf32>
    %248 = vector.broadcast %246 : vector<8x1xf32> to vector<8x256xf32>
    %249 = vector.broadcast %247 : vector<1x256xf32> to vector<8x256xf32>
    %250 = arith.mulf %248, %249 : vector<8x256xf32>
    %251 = arith.addf %245, %250 : vector<8x256xf32>
    %252 = vector.extract_strided_slice %240 {offsets = [0, 2], sizes = [8, 1], strides = [1, 1]} : vector<8x8xf32> to vector<8x1xf32>
    %253 = vector.extract_strided_slice %239 {offsets = [2, 0], sizes = [1, 256], strides = [1, 1]} : vector<8x256xf32> to vector<1x256xf32>
    %254 = vector.broadcast %252 : vector<8x1xf32> to vector<8x256xf32>
    %255 = vector.broadcast %253 : vector<1x256xf32> to vector<8x256xf32>
    %256 = arith.mulf %254, %255 : vector<8x256xf32>
    %257 = arith.addf %251, %256 : vector<8x256xf32>
    %258 = vector.extract_strided_slice %240 {offsets = [0, 3], sizes = [8, 1], strides = [1, 1]} : vector<8x8xf32> to vector<8x1xf32>
    %259 = vector.extract_strided_slice %239 {offsets = [3, 0], sizes = [1, 256], strides = [1, 1]} : vector<8x256xf32> to vector<1x256xf32>
    %260 = vector.broadcast %258 : vector<8x1xf32> to vector<8x256xf32>
    %261 = vector.broadcast %259 : vector<1x256xf32> to vector<8x256xf32>
    %262 = arith.mulf %260, %261 : vector<8x256xf32>
    %263 = arith.addf %257, %262 : vector<8x256xf32>
    %264 = vector.extract_strided_slice %240 {offsets = [0, 4], sizes = [8, 1], strides = [1, 1]} : vector<8x8xf32> to vector<8x1xf32>
    %265 = vector.extract_strided_slice %239 {offsets = [4, 0], sizes = [1, 256], strides = [1, 1]} : vector<8x256xf32> to vector<1x256xf32>
    %266 = vector.broadcast %264 : vector<8x1xf32> to vector<8x256xf32>
    %267 = vector.broadcast %265 : vector<1x256xf32> to vector<8x256xf32>
    %268 = arith.mulf %266, %267 : vector<8x256xf32>
    %269 = arith.addf %263, %268 : vector<8x256xf32>
    %270 = vector.extract_strided_slice %240 {offsets = [0, 5], sizes = [8, 1], strides = [1, 1]} : vector<8x8xf32> to vector<8x1xf32>
    %271 = vector.extract_strided_slice %239 {offsets = [5, 0], sizes = [1, 256], strides = [1, 1]} : vector<8x256xf32> to vector<1x256xf32>
    %272 = vector.broadcast %270 : vector<8x1xf32> to vector<8x256xf32>
    %273 = vector.broadcast %271 : vector<1x256xf32> to vector<8x256xf32>
    %274 = arith.mulf %272, %273 : vector<8x256xf32>
    %275 = arith.addf %269, %274 : vector<8x256xf32>
    %276 = vector.extract_strided_slice %240 {offsets = [0, 6], sizes = [8, 1], strides = [1, 1]} : vector<8x8xf32> to vector<8x1xf32>
    %277 = vector.extract_strided_slice %239 {offsets = [6, 0], sizes = [1, 256], strides = [1, 1]} : vector<8x256xf32> to vector<1x256xf32>
    %278 = vector.broadcast %276 : vector<8x1xf32> to vector<8x256xf32>
    %279 = vector.broadcast %277 : vector<1x256xf32> to vector<8x256xf32>
    %280 = arith.mulf %278, %279 : vector<8x256xf32>
    %281 = arith.addf %275, %280 : vector<8x256xf32>
    %282 = vector.extract_strided_slice %240 {offsets = [0, 7], sizes = [8, 1], strides = [1, 1]} : vector<8x8xf32> to vector<8x1xf32>
    %283 = vector.extract_strided_slice %239 {offsets = [7, 0], sizes = [1, 256], strides = [1, 1]} : vector<8x256xf32> to vector<1x256xf32>
    %284 = vector.broadcast %282 : vector<8x1xf32> to vector<8x256xf32>
    %285 = vector.broadcast %283 : vector<1x256xf32> to vector<8x256xf32>
    %286 = arith.mulf %284, %285 : vector<8x256xf32>
    %287 = arith.addf %281, %286 : vector<8x256xf32>
    %c0_39 = arith.constant 0 : index
    %c73 = arith.constant 73 : index
    %288 = vector.load %arg2[%c0_39, %c73] : memref<8x128xf32, #tpu.memory_space<vmem>>, vector<8x1xf32>
    %289 = vector.broadcast %288 : vector<8x1xf32> to vector<8x256xf32>
    %290 = arith.addf %287, %289 : vector<8x256xf32>
    %c0_40 = arith.constant 0 : index
    %c18 = arith.constant 18 : index
    %291 = vector.load %arg2[%c0_40, %c18] : memref<8x128xf32, #tpu.memory_space<vmem>>, vector<8x9xf32>
    %c0_41 = arith.constant 0 : index
    %c128_42 = arith.constant 128 : index
    %292 = vector.load %arg4[%c0_41, %c128_42] : memref<8x512xf32, #tpu.memory_space<vmem>>, vector<8x256xf32>
    tpu.vector_store %arg4[%c0_41, %c128_42], %290 {strides = array<i32>} : memref<8x512xf32, #tpu.memory_space<vmem>>, vector<8x256xf32>,
    %293 = vector.extract_strided_slice %291 {offsets = [0, 4], sizes = [8, 1], strides = [1, 1]} : vector<8x9xf32> to vector<8x1xf32>
    %294 = vector.broadcast %293 : vector<8x1xf32> to vector<8x256xf32>
    %295 = arith.mulf %290, %294 : vector<8x256xf32>
    %c0_43 = arith.constant 0 : index
    %c111_44 = arith.constant 111 : index
    %296 = vector.load %arg4[%c0_43, %c111_44] : memref<8x512xf32, #tpu.memory_space<vmem>>, vector<8x256xf32>
    %cst_45 = arith.constant 0.000000e+00 : f32
    %297 = vector.broadcast %cst_45 : f32 to vector<8x256xf32>
    %298 = arith.select %20, %297, %296 : vector<8x256xi1>, vector<8x256xf32>
    %299 = vector.extract_strided_slice %291 {offsets = [0, 0], sizes = [8, 1], strides = [1, 1]} : vector<8x9xf32> to vector<8x1xf32>
    %300 = vector.broadcast %299 : vector<8x1xf32> to vector<8x256xf32>
    %301 = arith.mulf %298, %300 : vector<8x256xf32>
    %302 = arith.addf %295, %301 : vector<8x256xf32>
    %c0_46 = arith.constant 0 : index
    %c112_47 = arith.constant 112 : index
    %303 = vector.load %arg4[%c0_46, %c112_47] : memref<8x512xf32, #tpu.memory_space<vmem>>, vector<8x256xf32>
    %304 = vector.extract_strided_slice %291 {offsets = [0, 1], sizes = [8, 1], strides = [1, 1]} : vector<8x9xf32> to vector<8x1xf32>
    %305 = vector.broadcast %304 : vector<8x1xf32> to vector<8x256xf32>
    %306 = arith.mulf %303, %305 : vector<8x256xf32>
    %307 = arith.addf %302, %306 : vector<8x256xf32>
    %c0_48 = arith.constant 0 : index
    %c113_49 = arith.constant 113 : index
    %308 = vector.load %arg4[%c0_48, %c113_49] : memref<8x512xf32, #tpu.memory_space<vmem>>, vector<8x256xf32>
    %cst_50 = arith.constant 0.000000e+00 : f32
    %309 = vector.broadcast %cst_50 : f32 to vector<8x256xf32>
    %310 = arith.select %22, %309, %308 : vector<8x256xi1>, vector<8x256xf32>
    %311 = vector.extract_strided_slice %291 {offsets = [0, 2], sizes = [8, 1], strides = [1, 1]} : vector<8x9xf32> to vector<8x1xf32>
    %312 = vector.broadcast %311 : vector<8x1xf32> to vector<8x256xf32>
    %313 = arith.mulf %310, %312 : vector<8x256xf32>
    %314 = arith.addf %307, %313 : vector<8x256xf32>
    %c0_51 = arith.constant 0 : index
    %c127_52 = arith.constant 127 : index
    %315 = vector.load %arg4[%c0_51, %c127_52] : memref<8x512xf32, #tpu.memory_space<vmem>>, vector<8x256xf32>
    %cst_53 = arith.constant 0.000000e+00 : f32
    %316 = vector.broadcast %cst_53 : f32 to vector<8x256xf32>
    %317 = arith.select %20, %316, %315 : vector<8x256xi1>, vector<8x256xf32>
    %318 = vector.extract_strided_slice %291 {offsets = [0, 3], sizes = [8, 1], strides = [1, 1]} : vector<8x9xf32> to vector<8x1xf32>
    %319 = vector.broadcast %318 : vector<8x1xf32> to vector<8x256xf32>
    %320 = arith.mulf %317, %319 : vector<8x256xf32>
    %321 = arith.addf %314, %320 : vector<8x256xf32>
    %c0_54 = arith.constant 0 : index
    %c129_55 = arith.constant 129 : index
    %322 = vector.load %arg4[%c0_54, %c129_55] : memref<8x512xf32, #tpu.memory_space<vmem>>, vector<8x256xf32>
    %cst_56 = arith.constant 0.000000e+00 : f32
    %323 = vector.broadcast %cst_56 : f32 to vector<8x256xf32>
    %324 = arith.select %22, %323, %322 : vector<8x256xi1>, vector<8x256xf32>
    %325 = vector.extract_strided_slice %291 {offsets = [0, 5], sizes = [8, 1], strides = [1, 1]} : vector<8x9xf32> to vector<8x1xf32>
    %326 = vector.broadcast %325 : vector<8x1xf32> to vector<8x256xf32>
    %327 = arith.mulf %324, %326 : vector<8x256xf32>
    %328 = arith.addf %321, %327 : vector<8x256xf32>
    %c0_57 = arith.constant 0 : index
    %c143_58 = arith.constant 143 : index
    %329 = vector.load %arg4[%c0_57, %c143_58] : memref<8x512xf32, #tpu.memory_space<vmem>>, vector<8x256xf32>
    %cst_59 = arith.constant 0.000000e+00 : f32
    %330 = vector.broadcast %cst_59 : f32 to vector<8x256xf32>
    %331 = arith.select %20, %330, %329 : vector<8x256xi1>, vector<8x256xf32>
    %332 = vector.extract_strided_slice %291 {offsets = [0, 6], sizes = [8, 1], strides = [1, 1]} : vector<8x9xf32> to vector<8x1xf32>
    %333 = vector.broadcast %332 : vector<8x1xf32> to vector<8x256xf32>
    %334 = arith.mulf %331, %333 : vector<8x256xf32>
    %335 = arith.addf %328, %334 : vector<8x256xf32>
    %c0_60 = arith.constant 0 : index
    %c144_61 = arith.constant 144 : index
    %336 = vector.load %arg4[%c0_60, %c144_61] : memref<8x512xf32, #tpu.memory_space<vmem>>, vector<8x256xf32>
    %337 = vector.extract_strided_slice %291 {offsets = [0, 7], sizes = [8, 1], strides = [1, 1]} : vector<8x9xf32> to vector<8x1xf32>
    %338 = vector.broadcast %337 : vector<8x1xf32> to vector<8x256xf32>
    %339 = arith.mulf %336, %338 : vector<8x256xf32>
    %340 = arith.addf %335, %339 : vector<8x256xf32>
    %c0_62 = arith.constant 0 : index
    %c145_63 = arith.constant 145 : index
    %341 = vector.load %arg4[%c0_62, %c145_63] : memref<8x512xf32, #tpu.memory_space<vmem>>, vector<8x256xf32>
    %cst_64 = arith.constant 0.000000e+00 : f32
    %342 = vector.broadcast %cst_64 : f32 to vector<8x256xf32>
    %343 = arith.select %22, %342, %341 : vector<8x256xi1>, vector<8x256xf32>
    %344 = vector.extract_strided_slice %291 {offsets = [0, 8], sizes = [8, 1], strides = [1, 1]} : vector<8x9xf32> to vector<8x1xf32>
    %345 = vector.broadcast %344 : vector<8x1xf32> to vector<8x256xf32>
    %346 = arith.mulf %343, %345 : vector<8x256xf32>
    %347 = arith.addf %340, %346 : vector<8x256xf32>
    %c0_65 = arith.constant 0 : index
    %c74 = arith.constant 74 : index
    %348 = vector.load %arg2[%c0_65, %c74] : memref<8x128xf32, #tpu.memory_space<vmem>>, vector<8x1xf32>
    %349 = vector.broadcast %348 : vector<8x1xf32> to vector<8x256xf32>
    %350 = arith.addf %347, %349 : vector<8x256xf32>
    %351 = arith.select %25, %290, %350 : vector<8x256xi1>, vector<8x256xf32>
    %c0_66 = arith.constant 0 : index
    %c0_67 = arith.constant 0 : index
    %352 = vector.load %arg2[%c0_66, %c0_67] : memref<8x128xf32, #tpu.memory_space<vmem>>, vector<8x9xf32>
    %c0_68 = arith.constant 0 : index
    %c128_69 = arith.constant 128 : index
    %353 = vector.load %arg4[%c0_68, %c128_69] : memref<8x512xf32, #tpu.memory_space<vmem>>, vector<8x256xf32>
    tpu.vector_store %arg4[%c0_68, %c128_69], %27 {strides = array<i32>} : memref<8x512xf32, #tpu.memory_space<vmem>>, vector<8x256xf32>,
    %354 = vector.extract_strided_slice %352 {offsets = [0, 4], sizes = [8, 1], strides = [1, 1]} : vector<8x9xf32> to vector<8x1xf32>
    %355 = vector.broadcast %354 : vector<8x1xf32> to vector<8x256xf32>
    %356 = arith.mulf %27, %355 : vector<8x256xf32>
    %c0_70 = arith.constant 0 : index
    %c111_71 = arith.constant 111 : index
    %357 = vector.load %arg4[%c0_70, %c111_71] : memref<8x512xf32, #tpu.memory_space<vmem>>, vector<8x256xf32>
    %cst_72 = arith.constant 0.000000e+00 : f32
    %358 = vector.broadcast %cst_72 : f32 to vector<8x256xf32>
    %359 = arith.select %20, %358, %357 : vector<8x256xi1>, vector<8x256xf32>
    %360 = vector.extract_strided_slice %352 {offsets = [0, 0], sizes = [8, 1], strides = [1, 1]} : vector<8x9xf32> to vector<8x1xf32>
    %361 = vector.broadcast %360 : vector<8x1xf32> to vector<8x256xf32>
    %362 = arith.mulf %359, %361 : vector<8x256xf32>
    %363 = arith.addf %356, %362 : vector<8x256xf32>
    %c0_73 = arith.constant 0 : index
    %c112_74 = arith.constant 112 : index
    %364 = vector.load %arg4[%c0_73, %c112_74] : memref<8x512xf32, #tpu.memory_space<vmem>>, vector<8x256xf32>
    %365 = vector.extract_strided_slice %352 {offsets = [0, 1], sizes = [8, 1], strides = [1, 1]} : vector<8x9xf32> to vector<8x1xf32>
    %366 = vector.broadcast %365 : vector<8x1xf32> to vector<8x256xf32>
    %367 = arith.mulf %364, %366 : vector<8x256xf32>
    %368 = arith.addf %363, %367 : vector<8x256xf32>
    %c0_75 = arith.constant 0 : index
    %c113_76 = arith.constant 113 : index
    %369 = vector.load %arg4[%c0_75, %c113_76] : memref<8x512xf32, #tpu.memory_space<vmem>>, vector<8x256xf32>
    %cst_77 = arith.constant 0.000000e+00 : f32
    %370 = vector.broadcast %cst_77 : f32 to vector<8x256xf32>
    %371 = arith.select %22, %370, %369 : vector<8x256xi1>, vector<8x256xf32>
    %372 = vector.extract_strided_slice %352 {offsets = [0, 2], sizes = [8, 1], strides = [1, 1]} : vector<8x9xf32> to vector<8x1xf32>
    %373 = vector.broadcast %372 : vector<8x1xf32> to vector<8x256xf32>
    %374 = arith.mulf %371, %373 : vector<8x256xf32>
    %375 = arith.addf %368, %374 : vector<8x256xf32>
    %c0_78 = arith.constant 0 : index
    %c127_79 = arith.constant 127 : index
    %376 = vector.load %arg4[%c0_78, %c127_79] : memref<8x512xf32, #tpu.memory_space<vmem>>, vector<8x256xf32>
    %cst_80 = arith.constant 0.000000e+00 : f32
    %377 = vector.broadcast %cst_80 : f32 to vector<8x256xf32>
    %378 = arith.select %20, %377, %376 : vector<8x256xi1>, vector<8x256xf32>
    %379 = vector.extract_strided_slice %352 {offsets = [0, 3], sizes = [8, 1], strides = [1, 1]} : vector<8x9xf32> to vector<8x1xf32>
    %380 = vector.broadcast %379 : vector<8x1xf32> to vector<8x256xf32>
    %381 = arith.mulf %378, %380 : vector<8x256xf32>
    %382 = arith.addf %375, %381 : vector<8x256xf32>
    %c0_81 = arith.constant 0 : index
    %c129_82 = arith.constant 129 : index
    %383 = vector.load %arg4[%c0_81, %c129_82] : memref<8x512xf32, #tpu.memory_space<vmem>>, vector<8x256xf32>
    %cst_83 = arith.constant 0.000000e+00 : f32
    %384 = vector.broadcast %cst_83 : f32 to vector<8x256xf32>
    %385 = arith.select %22, %384, %383 : vector<8x256xi1>, vector<8x256xf32>
    %386 = vector.extract_strided_slice %352 {offsets = [0, 5], sizes = [8, 1], strides = [1, 1]} : vector<8x9xf32> to vector<8x1xf32>
    %387 = vector.broadcast %386 : vector<8x1xf32> to vector<8x256xf32>
    %388 = arith.mulf %385, %387 : vector<8x256xf32>
    %389 = arith.addf %382, %388 : vector<8x256xf32>
    %c0_84 = arith.constant 0 : index
    %c143_85 = arith.constant 143 : index
    %390 = vector.load %arg4[%c0_84, %c143_85] : memref<8x512xf32, #tpu.memory_space<vmem>>, vector<8x256xf32>
    %cst_86 = arith.constant 0.000000e+00 : f32
    %391 = vector.broadcast %cst_86 : f32 to vector<8x256xf32>
    %392 = arith.select %20, %391, %390 : vector<8x256xi1>, vector<8x256xf32>
    %393 = vector.extract_strided_slice %352 {offsets = [0, 6], sizes = [8, 1], strides = [1, 1]} : vector<8x9xf32> to vector<8x1xf32>
    %394 = vector.broadcast %393 : vector<8x1xf32> to vector<8x256xf32>
    %395 = arith.mulf %392, %394 : vector<8x256xf32>
    %396 = arith.addf %389, %395 : vector<8x256xf32>
    %c0_87 = arith.constant 0 : index
    %c144_88 = arith.constant 144 : index
    %397 = vector.load %arg4[%c0_87, %c144_88] : memref<8x512xf32, #tpu.memory_space<vmem>>, vector<8x256xf32>
    %398 = vector.extract_strided_slice %352 {offsets = [0, 7], sizes = [8, 1], strides = [1, 1]} : vector<8x9xf32> to vector<8x1xf32>
    %399 = vector.broadcast %398 : vector<8x1xf32> to vector<8x256xf32>
    %400 = arith.mulf %397, %399 : vector<8x256xf32>
    %401 = arith.addf %396, %400 : vector<8x256xf32>
    %c0_89 = arith.constant 0 : index
    %c145_90 = arith.constant 145 : index
    %402 = vector.load %arg4[%c0_89, %c145_90] : memref<8x512xf32, #tpu.memory_space<vmem>>, vector<8x256xf32>
    %cst_91 = arith.constant 0.000000e+00 : f32
    %403 = vector.broadcast %cst_91 : f32 to vector<8x256xf32>
    %404 = arith.select %22, %403, %402 : vector<8x256xi1>, vector<8x256xf32>
    %405 = vector.extract_strided_slice %352 {offsets = [0, 8], sizes = [8, 1], strides = [1, 1]} : vector<8x9xf32> to vector<8x1xf32>
    %406 = vector.broadcast %405 : vector<8x1xf32> to vector<8x256xf32>
    %407 = arith.mulf %404, %406 : vector<8x256xf32>
    %408 = arith.addf %401, %407 : vector<8x256xf32>
    %c0_92 = arith.constant 0 : index
    %c67 = arith.constant 67 : index
    %409 = vector.load %arg2[%c0_92, %c67] : memref<8x128xf32, #tpu.memory_space<vmem>>, vector<8x1xf32>
    %410 = vector.broadcast %409 : vector<8x1xf32> to vector<8x256xf32>
    %411 = arith.addf %408, %410 : vector<8x256xf32>
    %cst_93 = arith.constant 0.000000e+00 : f32
    %412 = vector.broadcast %cst_93 : f32 to vector<8x256xf32>
    %413 = arith.maximumf %411, %412 : vector<8x256xf32>
    %c0_94 = arith.constant 0 : index
    %c27 = arith.constant 27 : index
    %414 = vector.load %arg2[%c0_94, %c27] : memref<8x128xf32, #tpu.memory_space<vmem>>, vector<8x8xf32>
    %415 = vector.extract_strided_slice %414 {offsets = [0, 0], sizes = [8, 1], strides = [1, 1]} : vector<8x8xf32> to vector<8x1xf32>
    %416 = vector.extract_strided_slice %413 {offsets = [0, 0], sizes = [1, 256], strides = [1, 1]} : vector<8x256xf32> to vector<1x256xf32>
    %417 = vector.broadcast %415 : vector<8x1xf32> to vector<8x256xf32>
    %418 = vector.broadcast %416 : vector<1x256xf32> to vector<8x256xf32>
    %419 = arith.mulf %417, %418 : vector<8x256xf32>
    %420 = vector.extract_strided_slice %414 {offsets = [0, 1], sizes = [8, 1], strides = [1, 1]} : vector<8x8xf32> to vector<8x1xf32>
    %421 = vector.extract_strided_slice %413 {offsets = [1, 0], sizes = [1, 256], strides = [1, 1]} : vector<8x256xf32> to vector<1x256xf32>
    %422 = vector.broadcast %420 : vector<8x1xf32> to vector<8x256xf32>
    %423 = vector.broadcast %421 : vector<1x256xf32> to vector<8x256xf32>
    %424 = arith.mulf %422, %423 : vector<8x256xf32>
    %425 = arith.addf %419, %424 : vector<8x256xf32>
    %426 = vector.extract_strided_slice %414 {offsets = [0, 2], sizes = [8, 1], strides = [1, 1]} : vector<8x8xf32> to vector<8x1xf32>
    %427 = vector.extract_strided_slice %413 {offsets = [2, 0], sizes = [1, 256], strides = [1, 1]} : vector<8x256xf32> to vector<1x256xf32>
    %428 = vector.broadcast %426 : vector<8x1xf32> to vector<8x256xf32>
    %429 = vector.broadcast %427 : vector<1x256xf32> to vector<8x256xf32>
    %430 = arith.mulf %428, %429 : vector<8x256xf32>
    %431 = arith.addf %425, %430 : vector<8x256xf32>
    %432 = vector.extract_strided_slice %414 {offsets = [0, 3], sizes = [8, 1], strides = [1, 1]} : vector<8x8xf32> to vector<8x1xf32>
    %433 = vector.extract_strided_slice %413 {offsets = [3, 0], sizes = [1, 256], strides = [1, 1]} : vector<8x256xf32> to vector<1x256xf32>
    %434 = vector.broadcast %432 : vector<8x1xf32> to vector<8x256xf32>
    %435 = vector.broadcast %433 : vector<1x256xf32> to vector<8x256xf32>
    %436 = arith.mulf %434, %435 : vector<8x256xf32>
    %437 = arith.addf %431, %436 : vector<8x256xf32>
    %438 = vector.extract_strided_slice %414 {offsets = [0, 4], sizes = [8, 1], strides = [1, 1]} : vector<8x8xf32> to vector<8x1xf32>
    %439 = vector.extract_strided_slice %413 {offsets = [4, 0], sizes = [1, 256], strides = [1, 1]} : vector<8x256xf32> to vector<1x256xf32>
    %440 = vector.broadcast %438 : vector<8x1xf32> to vector<8x256xf32>
    %441 = vector.broadcast %439 : vector<1x256xf32> to vector<8x256xf32>
    %442 = arith.mulf %440, %441 : vector<8x256xf32>
    %443 = arith.addf %437, %442 : vector<8x256xf32>
    %444 = vector.extract_strided_slice %414 {offsets = [0, 5], sizes = [8, 1], strides = [1, 1]} : vector<8x8xf32> to vector<8x1xf32>
    %445 = vector.extract_strided_slice %413 {offsets = [5, 0], sizes = [1, 256], strides = [1, 1]} : vector<8x256xf32> to vector<1x256xf32>
    %446 = vector.broadcast %444 : vector<8x1xf32> to vector<8x256xf32>
    %447 = vector.broadcast %445 : vector<1x256xf32> to vector<8x256xf32>
    %448 = arith.mulf %446, %447 : vector<8x256xf32>
    %449 = arith.addf %443, %448 : vector<8x256xf32>
    %450 = vector.extract_strided_slice %414 {offsets = [0, 6], sizes = [8, 1], strides = [1, 1]} : vector<8x8xf32> to vector<8x1xf32>
    %451 = vector.extract_strided_slice %413 {offsets = [6, 0], sizes = [1, 256], strides = [1, 1]} : vector<8x256xf32> to vector<1x256xf32>
    %452 = vector.broadcast %450 : vector<8x1xf32> to vector<8x256xf32>
    %453 = vector.broadcast %451 : vector<1x256xf32> to vector<8x256xf32>
    %454 = arith.mulf %452, %453 : vector<8x256xf32>
    %455 = arith.addf %449, %454 : vector<8x256xf32>
    %456 = vector.extract_strided_slice %414 {offsets = [0, 7], sizes = [8, 1], strides = [1, 1]} : vector<8x8xf32> to vector<8x1xf32>
    %457 = vector.extract_strided_slice %413 {offsets = [7, 0], sizes = [1, 256], strides = [1, 1]} : vector<8x256xf32> to vector<1x256xf32>
    %458 = vector.broadcast %456 : vector<8x1xf32> to vector<8x256xf32>
    %459 = vector.broadcast %457 : vector<1x256xf32> to vector<8x256xf32>
    %460 = arith.mulf %458, %459 : vector<8x256xf32>
    %461 = arith.addf %455, %460 : vector<8x256xf32>
    %c0_95 = arith.constant 0 : index
    %c68 = arith.constant 68 : index
    %462 = vector.load %arg2[%c0_95, %c68] : memref<8x128xf32, #tpu.memory_space<vmem>>, vector<8x1xf32>
    %463 = vector.broadcast %462 : vector<8x1xf32> to vector<8x256xf32>
    %464 = arith.addf %461, %463 : vector<8x256xf32>
    %465 = arith.addf %351, %464 : vector<8x256xf32>
    %c0_96 = arith.constant 0 : index
    %c0_97 = arith.constant 0 : index
    %c0_98 = arith.constant 0 : index
    %466 = vector.load %arg3[%c0_96, %c0_97, %c0_98] : memref<1x8x256xf32, #tpu.memory_space<vmem>>, vector<1x8x256xf32>
    %467 = vector.shape_cast %466 : vector<1x8x256xf32> to vector<8x256xf32>
    %468 = vector.shape_cast %465 : vector<8x256xf32> to vector<1x8x256xf32>
    tpu.vector_store %arg3[%c0_96, %c0_97, %c0_98], %468 {strides = array<i32>} : memref<1x8x256xf32, #tpu.memory_space<vmem>>, vector<1x8x256xf32>,
    return
  }
  func.func @transform_0(%arg0: i32) -> (i32, i32, i32) {
    %c0_i32 = arith.constant 0 : i32
    %c0_i32_0 = arith.constant 0 : i32
    %c0_i32_1 = arith.constant 0 : i32
    return %arg0, %c0_i32, %c0_i32_0 : i32, i32, i32
  }
  func.func @transform_1(%arg0: i32) -> (i32, i32) {
    %c0_i32 = arith.constant 0 : i32
    %c0_i32_0 = arith.constant 0 : i32
    %c0_i32_1 = arith.constant 0 : i32
    return %c0_i32, %c0_i32_0 : i32, i32
  }
  func.func @transform_2(%arg0: i32) -> (i32, i32, i32) {
    %c0_i32 = arith.constant 0 : i32
    %c0_i32_0 = arith.constant 0 : i32
    %c0_i32_1 = arith.constant 0 : i32
    return %arg0, %c0_i32, %c0_i32_0 : i32, i32, i32
  }
}

</mosaic_0001>

<bundles_post_ra>
// kernel: tpu_custom_call.1
= control target key start
LH: loop header
LB: loop body
LE: loop exit
PB: predicated region body
PF: predicated region fallthrough
CT: control target
= control target key end

     0   :  { %7 = vsyncpa [#allocation4], 0  ;;  %s2915_s0 = inlined_call_operand.hbm [shape: f32[2,8,256], index: 0, kind: input, shape index: {}]   ;;  %s2916_s1 = inlined_call_operand.hbm [shape: f32[8,128], index: 1, kind: input, shape index: {}]   ;;  %s2917_s2 = inlined_call_operand.hbm [shape: f32[2,8,256], index: 2, kind: output, shape index: {}]  }
   0x1   :  { %9 = vsyncpa [#allocation4 + $0x1], 0 }
   0x2   :  { %10 = vsyncpa [#allocation7], 0 }
   0x3   :  { %11 = vsyncpa [#allocation5], 0 }
   0x4   :  { %13 = vsyncpa [#allocation5 + $0x1], 0  ;;  %s1987_s9 = smov 0   ;;  %s1989_s10 = smov 0  }
   0x5   :  { %s1991_s11 = smov 0   ;;  %s1993_s12 = smov 0  }
   0x6 LB: > { %s2008_s13 = sadd.s32 4294967295, %s1885_s12   ;;  %s1508_s14 = sadd.s32 4294967294, %s1885_s12   ;;  %s1885_s12 = sphi %s1993_s12, %s2978_s12   ;;  %s1881_s11 = sphi %s1991_s11, %s2977_s11   ;;  %s1877_s10 = sphi %s1989_s10, %s2976_s10   ;;  %s1873_s9 = sphi %s1987_s9, %s2975_s9  }
   0x7   : > { %p39_p0 = scmp.ne.s32.totalorder %s1877_s10, %s1873_s9  ;;  %p2918_p1 = scmp.eq.s32.totalorder %s2008_s13, 0 }
   0x8   : > { %p90_p3 = scmp.eq.s32.totalorder %s1508_s14, 1  ;;  %p1509_p5 = scmp.ge.s32.totalorder %s1885_s12, 1 }
   0x9   : > { %p2017_p4 = por %p2918_p1, %p39_p0  ;;  %p97_p7 = scmp.lt.s32.totalorder %s1885_s12, 3 }
   0xa   : > { %p2022_p6 = por %p90_p3, %p39_p0  ;;  %s1887_s18 = smov [#allocation6]  }
   0xb   : > { %s2934_s15 = scalar_select %p2017_p4, 1, 0 }
   0xc   : > { %s2935_s16 = scalar_select %p2022_p6, 1, 0 }
   0xd   : > { %p2027_p8 = pnand %p1509_p5, %p97_p7  ;;  %s110_s19 = sshll.u32 %s1887_s18, 4  ;;  %s111_s19 = int_to_ptr.vmem [resolvable:$true] %s110_s19 }
   0xe   : > { %s2035_s20 = sadd.s32 1, %s1885_s12   ;;  %s26_s24 = sadd.s32 1, %s1881_s11 }
   0xf   : > { %s2936_s17 = scalar_select %p2027_p8, 1, 0 }
  0x10   : > { %p1534_p10 = pneg %p2027_p8  ;;  %s23_s22 = ssub.s32 %s1885_s12, %s2035_s20 }
  0x11   : > { %p2045_p12 = scmp.eq.s32.totalorder %s23_s22, 0  ;;  %s1757_s27 = scalar_lea.hbm %s2916_s1, 128 }
  0x12   : > { %p2039_p11 = pnand %p1534_p10, %p2918_p1  ;;  %p1758_p0 = scmp.ne.s32.totalorder %s2916_s1, %s1757_s27 }
  0x13   : > { %s2938_s23 = scalar_select %p2045_p12, 1, 0 }
  0x14   : > { %p1759_p3 = pneg %p2039_p11  ;;  %p1764_p10 = scmp.lt.u32.totalorder %s1757_s27, %s2916_s1 }
  0x16   : > { %p1760_p5 = pnand %p1759_p3, %p1758_p0 }
  0x18   : > { %p1761_p7 = pneg %p1760_p5 }
  0x1a   : > { %p1766_p9 = pnand %p1764_p10, %p1761_p7 }
  0x1c   : > { %1769 = shalt.err (!%p1766_p9)
}
  0x1d   : > { %s1770_s4 = scalar_lea.vmem %s111_s19, 128  ;;  %p1778_p6 = scmp.lt.s32.totalorder %s111_s19, %s111_s19 }
  0x1e   : > { %p1771_p1 = scmp.ne.s32.totalorder %s111_s19, %s1770_s4  ;;  %p1779_p4 = scmp.lt.s32.totalorder %s1770_s4, %s1770_s4 }
  0x20   : > { %p1773_p2 = pnand %p1771_p1, %p1759_p3  ;;  %p1780_p8 = por %p1779_p4, %p1778_p6 }
  0x22   : > { %p1774_p13 = pneg %p1773_p2 }
  0x24   : > { %p1781_p12 = pnand %p1780_p8, %p1774_p13 }
  0x26   : > { %1784 = shalt.err (!%p1781_p12)
}
  0x27   : > { %1537 = dma.hbm_to_vmem [thread:$0]  (!%p2039_p11), %s2916_s1, 128, %s111_s19, [#allocation7]  }
  0x28   : > { %p2939_p1 = scmp.ne.s32.totalorder %s2938_s23, 0  ;;  %p34_p2 = scmp.eq.s32.totalorder %s1885_s12, 0 }
  0x29   : > { %p2940_p4 = scmp.ne.s32.totalorder %s1881_s11, %s1877_s10  ;;  %p2941_p6 = scmp.eq.s32.totalorder %s2008_s13, 1 }
  0x2a   : > { %s2071_s7 = scalar_select %p2939_p1, %s1881_s11, %s26_s24  }
  0x2b   : > { %p2079_p8 = por %p2941_p6, %p2940_p4  ;;  %p1547_p9 = scmp.lt.s32.totalorder %s1885_s12, 2 }
  0x2c   : > { %s121_s14 = sand.u32 1, %s1881_s11   ;;  %p2943_p12 = pmov %p2940_p4 }
  0x2d   : > { %s1512_s18 = sshll.u32 %s121_s14, 4  ;;  %s1524_s21 = sshll.u32 %s1885_s12, 8 }
  0x2e   : > { %p35_p13 = por %p34_p2, %p2943_p12  ;;  %s2092_s19 = scalar_lea.hbm %s2915_s0, %s1524_s21 }
  0x2f   : > { %s125_s23 = scalar_lea.vmem [#allocation3], %s1512_s18  ;;  %s122_s27 = scalar_lea.sflag [#allocation4], %s121_s14 }
  0x30   : > { %s133_s24 = sshll.u32 %s125_s23, 4  ;;  %p2094_p11 = pnand %p1547_p9, %p35_p13  ;;  %s2098_s24 = int_to_ptr.vmem [resolvable:$true] %s133_s24 }
  0x31   : > { %s1785_s28 = scalar_lea.hbm %s2092_s19, 256  ;;  %s1790_s3 = scalar_lea.hbm %s2915_s0, 512 }
  0x32   : > { %p1786_p0 = scmp.ne.s32.totalorder %s2092_s19, %s1785_s28  ;;  %p1787_p3 = pneg %p2094_p11 }
  0x33   : > { %p1791_p10 = scmp.lt.u32.totalorder %s2092_s19, %s2915_s0  ;;  %p1792_p1 = scmp.lt.u32.totalorder %s1790_s3, %s1785_s28 }
  0x34   : > { %p1788_p5 = pnand %p1787_p3, %p1786_p0  ;;  %p1794_p4 = scmp.lt.u32.totalorder %s1785_s28, %s2092_s19 }
  0x35   : > { %p1793_p2 = por %p1792_p1, %p1791_p10 }
  0x36   : > { %p1789_p7 = pneg %p1788_p5 }
  0x37   : > { %p1795_p6 = por %p1794_p4, %p1793_p2 }
  0x39   : > { %p1796_p9 = pnand %p1795_p6, %p1789_p7 }
  0x3b   : > { %1799 = shalt.err (!%p1796_p9)
}
  0x3c   : > { %s1800_s6 = scalar_lea.vmem %s2098_s24, 256  ;;  %s1888_s14 = smov [#allocation3]  }
  0x3d   : > { %p1801_p12 = scmp.ne.s32.totalorder %s2098_s24, %s1800_s6  ;;  %s1805_s18 = sshll.u32 %s1888_s14, 4  ;;  %s1806_s18 = int_to_ptr.vmem [resolvable:$false] %s1805_s18 }
  0x3e   : > { %s1807_s21 = scalar_lea.vmem %s1806_s18, 512  ;;  %p1808_p5 = scmp.lt.s32.totalorder %s2098_s24, %s1806_s18 }
  0x3f   : > { %p1803_p13 = pnand %p1801_p12, %p1787_p3  ;;  %p1809_p10 = scmp.lt.s32.totalorder %s1807_s21, %s1800_s6 }
  0x41   : > { %p1804_p0 = pneg %p1803_p13  ;;  %p1810_p1 = por %p1809_p10, %p1808_p5 }
  0x43   : > { %p1811_p2 = pnand %p1810_p1, %p1804_p0 }
  0x45   : > { %1814 = shalt.err (!%p1811_p2)
}
  0x46   : > { %1541 = dma.hbm_to_vmem [thread:$0]  (!%p2094_p11), %s2092_s19, 256, %s2098_s24, %s122_s27  }
  0x47   : > { %p2945_p7 = scmp.ne.s32.totalorder %s2936_s17, 0 }
  0x49   : > { %142 = sbr.rel (%p2945_p7) target bundleno = 1501 (0x5dd), region = 28 }
  0x50   : > { %s2128_s22 = sand.u32 1, %s1877_s10   ;;  %p2946_p3 = scmp.ne.s32.totalorder %s2934_s15, 0 }
  0x51   : > { %s2921_s25 = sshll.u32 %s2128_s22, 4  ;;  %s145_s23 = scalar_lea.sflag [#allocation4], %s2128_s22 }
  0x52   : > { %s2134_s28 = scalar_lea.vmem [#allocation3], %s2921_s25 }
  0x53   : > { %1860 = dma.done.wait (%p2946_p3), %s145_s23, 256  }
  0x54   : > { %1862 = vsyncadd (%p2946_p3), %s145_s23, 4294967040  ;;  %p2947_p11 = scmp.eq.s32.totalorder %s2008_s13, 0 }
  0x56   : > { %1864 = dma.done.wait (%p2947_p11), [#allocation7], 128   ;;  %p2948_p4 = pmov %p2947_p11 }
  0x57   : > { %v1889_v0 = vmov 37   ;;  %v1890_v1 = vmov 35   ;;  %v2144_v2 = vld [vmem:[#allocation6] sm:$0xff]  ;;  %v1891_v3 = vmov 38   ;;  %v1892_v4 = vmov 36   ;;  %s1901_s15 = smov 17  }
  0x58   : > { %1866 = vsyncadd (%p2948_p4), [#allocation7], 4294967168  ;;  %1667 = vset.pattern.permute.xlu1 %v1889_v0  ;;  %1665 = vset.pattern.permute.xlu0 %v1890_v1  ;;  %v1893_v5 = vmov 39   ;;  %v1894_v6 = vmov 40   ;;  %v1895_v7 = vmov 41   ;;  %v1896_v8 = vmov 69  }
  0x59   : > { %246 = vperm.xlu1 %1667, %v2144_v2   ;;  %216 = vperm.xlu0 %1665, %v2144_v2   ;;  %v1897_v9 = vmov 42   ;;  %v1898_v10 = vmov 13   ;;  %v1899_v11 = vmov 10   ;;  %v1900_v12 = vmov 0.0   ;;  %s2924_s17 = smov 113   ;;  %s1910_s19 = smov 15  }
  0x5a   : > { %v1902_v13 = vmov 14   ;;  %v1903_v14 = vmov 16   ;;  %v1904_v15 = vmov 15   ;;  %v1905_v16 = vmov 9   ;;  %s2926_s24 = smov 1   ;;  %s1913_s26 = smov 127  }
  0x5b   : > { %v1906_v17 = vmov 17   ;;  %v1907_v18 = vmov 11   ;;  %v1909_v19 = vmov 12   ;;  %v1911_v20 = vmov 70   ;;  %v2185_v25 = vld [vmem:[%s2134_s28] sm:$0xff]  ;;  %v2188_v26 = vld [vmem:[%s2134_s28 + $0x8] sm:$0xff] }
  0x5c   : > { %v177_v21 = vlaneseq  ;;  %s1914_s27 = smov 16   ;;  %s1915_s29 = smov 111   ;;  %vm369_vm0 = vcmask 138240   ;;  %vm413_vm2 = vcmask 121856   ;;  %vm400_vm3 = vcmask 130048  }
  0x5d   : > { %1668 = vset.pattern.permute.xlu1 %v1891_v3  ;;  %1666 = vset.pattern.permute.xlu0 %v1892_v4  ;;  %s2922_s30 = smov 112   ;;  %vm434_vm6 = vcmask 7168   ;;  %vm482_vm7 = vcmask 924672   ;;  %vm461_vm9 = vcmask 1039360   ;;  %vm526_vm10 = vcmask 908288   ;;  %s1917_s3 = smov 126  }
  0x5e   : > { %262 = vperm.xlu1 %1668, %v2144_v2   ;;  %230 = vperm.xlu0 %1666, %v2144_v2   ;;  %v2176_v22 = vshrl.u32 %v177_v21, 7  ;;  %vm513_vm11 = vcmask 916480   ;;  %s1918_s4 = smov 125   ;;  %s1919_s5 = smov 124  }
  0x5f   : > { %s1920_s6 = smov 123   ;;  %s1921_s14 = smov 122  }
  0x60   : > { %2949 = vst [vmem:[#allocation12_spill] sm:$0xff] %v2176_v22  ;;  %v2179_v23 = vsub.s32 0, %v2176_v22  ;;  %v2182_v24 = vsub.s32 1, %v2176_v22  ;;  %v2191_v27 = vsub.s32 2, %v2176_v22  ;;  %v2198_v32 = vsub.s32 3, %v2176_v22  ;;  %s1922_s18 = smov 121  }
  0x61   : > { %v2205_v35 = vsub.s32 4, %v2176_v22  ;;  %v2212_v42 = vsub.s32 5, %v2176_v22  ;;  %v2227_v55 = vsub.s32 6, %v2176_v22  ;;  %v2230_v3 = vsub.s32 7, %v2176_v22  ;;  %s1924_s21 = smov 108   ;;  %s1926_s23 = smov 10  }
  0x62   : > { %1669 = vset.pattern.permute.xlu1 %v1893_v5  ;;  %1670 = vset.pattern.permute.xlu0 %v1894_v6  ;;  %v222_v30 = vrot.slane %v2185_v25, %v2179_v23  ;;  %v226_v31 = vrot.slane %v2188_v26, %v2179_v23  ;;  %v236_v33 = vrot.slane %v2185_v25, %v2182_v24  ;;  %vm210_vm12 = vcmp.lt.s32.totalorder %v2176_v22, 4  ;;  %s1928_s25 = smov 11  }
  0x63   : > { %278 = vperm.xlu1 %1669, %v2144_v2   ;;  %294 = vperm.xlu0 %1670, %v2144_v2   ;;  %v240_v34 = vrot.slane %v2188_v26, %v2182_v24  ;;  %v252_v36 = vrot.slane %v2185_v25, %v2191_v27  ;;  %v256_v37 = vrot.slane %v2188_v26, %v2191_v27 }
  0x64   : > { %v268_v43 = vrot.slane %v2185_v25, %v2198_v32  ;;  %v272_v44 = vrot.slane %v2188_v26, %v2198_v32  ;;  %v284_v47 = vrot.slane %v2185_v25, %v2205_v35  ;;  %v288_v48 = vrot.slane %v2188_v26, %v2205_v35 }
  0x65   : > { %v300_v53 = vrot.slane %v2185_v25, %v2212_v42  ;;  %v304_v54 = vrot.slane %v2188_v26, %v2212_v42  ;;  %v316_v6 = vrot.slane %v2185_v25, %v2227_v55 }
  0x67   : > { %1671 = vset.pattern.permute.xlu1 %v1895_v7  ;;  %1673 = vset.pattern.permute.xlu0 %v1896_v8  ;;  %v320_v7 = vrot.slane %v2188_v26, %v2227_v55 }
  0x68   : > { %310 = vperm.xlu1 %1671, %v2144_v2   ;;  %342 = vperm.xlu0 %1673, %v2144_v2  }
  0x6c   : > { %1672 = vset.pattern.permute.xlu1 %v1897_v9  ;;  %1676 = vset.pattern.permute.xlu0 %v1898_v10 }
  0x6d   : > { %326 = vperm.xlu1 %1672, %v2144_v2   ;;  %352 = vperm.xlu0 %1676, %v2144_v2  }
  0x71   : > { %1674 = vset.pattern.permute.xlu1 %v1899_v11  ;;  %363 = vrot.lane.b32.xlu0 %v1900_v12, %s1901_s15  ;;  %v332_v11 = vrot.slane %v2185_v25, %v2230_v3 }
  0x72   : > { %385 = vperm.xlu1 %1674, %v2144_v2   ;;  %1680 = vset.pattern.permute.xlu0 %v1902_v13  ;;  %v336_v13 = vrot.slane %v2188_v26, %v2230_v3 }
  0x75   : > { %469 = vperm.xlu0 %1680, %v2144_v2  }
  0x76   : > { %1675 = vset.pattern.permute.xlu1 %v1903_v14 }
  0x77   : > { %498 = vperm.xlu1 %1675, %v2144_v2  }
  0x79   : > { %1681 = vset.pattern.permute.xlu0 %v1904_v15 }
  0x7a   : > { %490 = vperm.xlu0 %1681, %v2144_v2  }
  0x7b   : > { %1677 = vset.pattern.permute.xlu1 %v1905_v16 }
  0x7c   : > { %377 = vperm.xlu1 %1677, %v2144_v2  }
  0x7e   : > { %1682 = vset.pattern.permute.xlu0 %v1906_v17 }
  0x7f   : > { %534 = vperm.xlu0 %1682, %v2144_v2  }
  0x80   : > { %1678 = vset.pattern.permute.xlu1 %v1907_v18 }
  0x81   : > { %421 = vperm.xlu1 %1678, %v2144_v2  }
  0x83   : > { %480 = vrot.lane.b32.xlu0 %v1900_v12, %s2924_s17 }
  0x85   : > { %1679 = vset.pattern.permute.xlu1 %v1909_v19 }
  0x86   : > { %442 = vperm.xlu1 %1679, %v2144_v2  }
  0x8a   : > { %407 = vrot.lane.b32.xlu1 %v1900_v12, %s1910_s19 }
  0x8b   : > { %1683 = vset.pattern.permute.xlu1 %v1911_v20 }
  0x8e   : > { %428 = vrot.lane.b32.xlu1 %v1900_v12, %s2926_s24 }
  0x92   : > { %459 = vrot.lane.b32.xlu1 %v1900_v12, %s1913_s26 }
  0x96   : > { %544 = vperm.xlu1 %1683, %v2144_v2  }
  0xd8   : > { %v247_v28 = vpop.permute.xlu1 %246  ;;  %v217_v29 = vpop.permute.xlu0 %216 }
  0xd9   : > { %v227_v38 = vmul.f32 %v222_v30, %v217_v29  ;;  %v228_v39 = vmul.f32 %v226_v31, %v217_v29  ;;  %v257_v49 = vmul.f32 %v252_v36, %v247_v28  ;;  %v258_v50 = vmul.f32 %v256_v37, %v247_v28 }
  0xdd   : > { %v263_v40 = vpop.permute.xlu1 %262  ;;  %v231_v41 = vpop.permute.xlu0 %230 }
  0xde   : > { %v241_v45 = vmul.f32 %v236_v33, %v231_v41  ;;  %v242_v46 = vmul.f32 %v240_v34, %v231_v41  ;;  %v273_v56 = vmul.f32 %v268_v43, %v263_v40  ;;  %v274_v57 = vmul.f32 %v272_v44, %v263_v40 }
  0xe0   : > { %v243_v51 = vadd.f32 %v241_v45, %v227_v38  ;;  %v244_v52 = vadd.f32 %v242_v46, %v228_v39 }
  0xe2   : > { %v259_v58 = vadd.f32 %v257_v49, %v243_v51  ;;  %v260_v59 = vadd.f32 %v258_v50, %v244_v52  ;;  %v279_v60 = vpop.permute.xlu1 %278  ;;  %v295_v61 = vpop.permute.xlu0 %294 }
  0xe3   : > { %v289_v62 = vmul.f32 %v284_v47, %v279_v60  ;;  %v290_v63 = vmul.f32 %v288_v48, %v279_v60  ;;  %v305_v4 = vmul.f32 %v300_v53, %v295_v61  ;;  %v306_v5 = vmul.f32 %v304_v54, %v295_v61 }
  0xe4   : > { %v275_v0 = vadd.f32 %v273_v56, %v259_v58  ;;  %v276_v1 = vadd.f32 %v274_v57, %v260_v59 }
  0xe6   : > { %v291_v8 = vadd.f32 %v289_v62, %v275_v0  ;;  %v292_v9 = vadd.f32 %v290_v63, %v276_v1  ;;  %v178_v0 = vand.u32 127, %v177_v21 }
  0xe7   : > { %v311_v10 = vpop.permute.xlu1 %310  ;;  %v343_v30 = vpop.permute.xlu0 %342 }
  0xe8   : > { %v307_v14 = vadd.f32 %v305_v4, %v291_v8  ;;  %v308_v15 = vadd.f32 %v306_v5, %v292_v9  ;;  %v321_v16 = vmul.f32 %v316_v6, %v311_v10  ;;  %v322_v17 = vmul.f32 %v320_v7, %v311_v10 }
  0xe9   : > { %v184_v5 = vand.u32 15, %v178_v0  ;;  %v179_v7 = vadd.s32 128, %v178_v0 }
  0xea   : > { %v323_v19 = vadd.f32 %v321_v16, %v307_v14  ;;  %v324_v20 = vadd.f32 %v322_v17, %v308_v15 }
  0xeb   : > { %vm2295_vm1 = vcmp.eq.s32.totalorder %v184_v5, 0  ;;  %vm2308_vm5 = vcmp.eq.s32.totalorder %v184_v5, 15 }
  0xec   : > { %v327_v18 = vpop.permute.xlu1 %326  ;;  %v353_v50 = vpop.permute.xlu0 %352 }
  0xed   : > { %v337_v28 = vmul.f32 %v332_v11, %v327_v18  ;;  %v338_v29 = vmul.f32 %v336_v13, %v327_v18  ;;  %v191_v13 = vand.u32 15, %v179_v7 }
  0xef   : > { %v339_v31 = vadd.f32 %v337_v28, %v323_v19  ;;  %v340_v33 = vadd.f32 %v338_v29, %v324_v20  ;;  %vm2302_vm4 = vcmp.eq.s32.totalorder %v191_v13, 0  ;;  %vm2319_vm8 = vcmp.eq.s32.totalorder %v191_v13, 15 }
  0xf0   : > { %v364_v52 = vpop.permute.xlu0 %363 }
  0xf1   : > { %v346_v34 = vadd.f32 %v343_v30, %v340_v33  ;;  %v386_v36 = vpop.permute.xlu1 %385  ;;  %v345_v37 = vadd.f32 %v343_v30, %v339_v31 }
  0xf2   : > { %v388_v38 = vmul.f32 0.0, %v386_v36 }
  0xf3   : > { %v2240_v39 = vmax.f32 %v346_v34, 0.0  ;;  %v2245_v40 = vmax.f32 %v345_v37, 0.0 }
  0xf4   : > { %394 = vrot.lane.b32.xlu1 %v388_v38, %s1914_s27  ;;  %v2284_v53 = vpop.permute.xlu0 %469 }
  0xf5   : > { %367 = vrot.lane.b32.xlu0 %v2240_v39, %s1901_s15  ;;  %v389_v41 = vmul.f32 %v386_v36, %v2245_v40  ;;  %v390_v44 = vmul.f32 %v386_v36, %v2240_v39  ;;  %v355_v19 = vmul.f32 %v353_v50, %v2245_v40 }
  0xf6   : > { %v499_v43 = vpop.permute.xlu1 %498 }
  0xf7   : > { %v502_v45 = vmul.f32 %v499_v43, %v2240_v39  ;;  %v501_v46 = vmul.f32 %v499_v43, %v2245_v40  ;;  %v503_v47 = vmul.f32 0.0, %v499_v43 }
  0xf8   : > { %365 = vrot.lane.b32.xlu1 %v2245_v40, %s1901_s15 }
  0xf9   : > { %411 = vrot.lane.b32.xlu0 %v2240_v39, %s1910_s19  ;;  %v2286_v56 = vpop.permute.xlu0 %490 }
  0xfb   : > { %v378_v48 = vpop.permute.xlu1 %377 }
  0xfc   : > { %409 = vrot.lane.b32.xlu1 %v2245_v40, %s1910_s19 }
  0xfd   : > { %432 = vrot.lane.b32.xlu0 %v2240_v39, %s2926_s24 }
  0xfe   : > { %v2288_v58 = vpop.permute.xlu0 %534 }
 0x100   : > { %430 = vrot.lane.b32.xlu1 %v2245_v40, %s2926_s24  ;;  %v2280_v49 = vpop.permute.xlu1 %421  ;;  %s1931_s24 = smov 13  }
 0x101   : > { %457 = vrot.lane.b32.xlu0 %v2240_v39, %s1913_s26 }
 0x102   : > { %v2292_v61 = vpop.permute.xlu0 %480 }
 0x104   : > { %455 = vrot.lane.b32.xlu1 %v2245_v40, %s1913_s26 }
 0x105   : > { %396 = vrot.lane.b32.xlu0 %v389_v41, %s1914_s27  ;;  %v2282_v51 = vpop.permute.xlu1 %442 }
 0x108   : > { %476 = vrot.lane.b32.xlu1 %v2245_v40, %s2924_s17 }
 0x109   : > { %520 = vrot.lane.b32.xlu0 %v2245_v40, %s1915_s29  ;;  %v408_v54 = vpop.permute.xlu1 %407 }
 0x10c   : > { %478 = vrot.lane.b32.xlu1 %v2240_v39, %s2924_s17  ;;  %s1930_s17 = smov 12  }
 0x10d   : > { %524 = vrot.lane.b32.xlu0 %v1900_v12, %s1915_s29  ;;  %v429_v57 = vpop.permute.xlu1 %428 }
 0x110   : > { %398 = vrot.lane.b32.xlu1 %v390_v44, %s1914_s27 }
 0x111   : > { %509 = vrot.lane.b32.xlu0 %v502_v45, %s2922_s30  ;;  %v460_v59 = vpop.permute.xlu1 %459 }
 0x114   : > { %522 = vrot.lane.b32.xlu1 %v2240_v39, %s1915_s29 }
 0x115   : > { %v2290_v60 = vpop.permute.xlu1 %544 }
 0x118   : > { %507 = vrot.lane.b32.xlu1 %v501_v46, %s2922_s30 }
 0x11c   : > { %511 = vrot.lane.b32.xlu1 %v503_v47, %s2922_s30  ;;  %s1929_s30 = smov 115  }
 0x166   : > { %v395_v62 = vpop.permute.xlu1 %394 }
 0x167   : > { %v368_v63 = vpop.permute.xlu0 %367 }
 0x16a   : > { %v366_v1 = vpop.permute.xlu1 %365 }
 0x16b   : > { %v412_v4 = vpop.permute.xlu0 %411  ;;  %v370_v10 = vsel %vm369_vm0, %v364_v52, %v366_v1  ;;  %v371_v20 = vsel %vm369_vm0, %v366_v1, %v368_v63 }
 0x16c   : > { %v374_v14 = vsel %vm2295_vm1, 0.0, %v370_v10  ;;  %v375_v34 = vsel %vm2302_vm4, 0.0, %v371_v20 }
 0x16d   : > { %v380_v21 = vmul.f32 %v378_v48, %v374_v14  ;;  %v381_v41 = vmul.f32 %v378_v48, %v375_v34 }
 0x16e   : > { %v410_v6 = vpop.permute.xlu1 %409 }
 0x16f   : > { %v433_v8 = vpop.permute.xlu0 %432  ;;  %v414_v29 = vsel %vm413_vm2, %v408_v54, %v410_v6  ;;  %v382_v31 = vadd.f32 %v380_v21, %v355_v19  ;;  %v415_v44 = vsel %vm413_vm2, %v410_v6, %v412_v4 }
 0x170   : > { %v418_v36 = vsel %vm2308_vm5, 0.0, %v414_v29  ;;  %v419_v0 = vsel %vm2319_vm8, 0.0, %v415_v44 }
 0x171   : > { %v424_v45 = vmul.f32 %v2280_v49, %v418_v36 }
 0x172   : > { %v431_v11 = vpop.permute.xlu1 %430 }
 0x173   : > { %v458_v15 = vpop.permute.xlu0 %457  ;;  %v435_v37 = vsel %vm434_vm6, %v429_v57, %v431_v11  ;;  %v436_v52 = vsel %vm434_vm6, %v431_v11, %v433_v8  ;;  %v356_v57 = vmul.f32 %v353_v50, %v2240_v39  ;;  %v425_v11 = vmul.f32 %v2280_v49, %v419_v0 }
 0x174   : > { %v439_v54 = vsel %vm2295_vm1, 0.0, %v435_v37  ;;  %v440_v1 = vsel %vm2302_vm4, 0.0, %v436_v52  ;;  %v463_v5 = vsel %vm461_vm9, %v458_v15, %v460_v59 }
 0x175   : > { %v445_v4 = vmul.f32 %v2282_v51, %v439_v54  ;;  %v383_v6 = vadd.f32 %v381_v41, %v356_v57  ;;  %v467_v59 = vsel %vm2319_vm8, 0.0, %v463_v5 }
 0x176   : > { %v456_v16 = vpop.permute.xlu1 %455 }
 0x177   : > { %v397_v18 = vpop.permute.xlu0 %396  ;;  %v462_v48 = vsel %vm461_vm9, %v456_v16, %v458_v15  ;;  %v446_v16 = vmul.f32 %v2282_v51, %v440_v1 }
 0x178   : > { %v401_v30 = vsel %vm400_vm3, %v395_v62, %v397_v18  ;;  %v466_v50 = vsel %vm2308_vm5, 0.0, %v462_v48 }
 0x179   : > { %v405_v38 = vadd.f32 %v401_v30, %v382_v31  ;;  %v472_v15 = vmul.f32 %v2284_v53, %v466_v50  ;;  %v473_v30 = vmul.f32 %v2284_v53, %v467_v59 }
 0x17a   : > { %v477_v33 = vpop.permute.xlu1 %476 }
 0x17b   : > { %v521_v46 = vpop.permute.xlu0 %520  ;;  %v426_v62 = vadd.f32 %v424_v45, %v405_v38 }
 0x17d   : > { %v447_v13 = vadd.f32 %v445_v4, %v426_v62 }
 0x17e   : > { %v479_v47 = vpop.permute.xlu1 %478 }
 0x17f   : > { %v483_v63 = vsel %vm482_vm7, %v477_v33, %v479_v47  ;;  %v525_v14 = vpop.permute.xlu0 %524  ;;  %v484_v19 = vsel %vm482_vm7, %v479_v47, %v2292_v61  ;;  %v474_v33 = vadd.f32 %v472_v15, %v447_v13 }
 0x180   : > { %v487_v8 = vsel %vm2295_vm1, 0.0, %v483_v63  ;;  %v488_v51 = vsel %vm2302_vm4, 0.0, %v484_v19 }
 0x181   : > { %v493_v20 = vmul.f32 %v2286_v56, %v487_v8  ;;  %v494_v45 = vmul.f32 %v2286_v56, %v488_v51 }
 0x182   : > { %v399_v7 = vpop.permute.xlu1 %398 }
 0x183   : > { %v402_v10 = vsel %vm400_vm3, %v397_v18, %v399_v7  ;;  %v510_v36 = vpop.permute.xlu0 %509  ;;  %v495_v38 = vadd.f32 %v493_v20, %v474_v33 }
 0x184   : > { %v406_v21 = vadd.f32 %v402_v10, %v383_v6 }
 0x186   : > { %v427_v29 = vadd.f32 %v425_v11, %v406_v21  ;;  %v523_v18 = vpop.permute.xlu1 %522 }
 0x187   : > { %v527_v49 = vsel %vm526_vm10, %v521_v46, %v523_v18  ;;  %v528_v61 = vsel %vm526_vm10, %v523_v18, %v525_v14  ;;  %v1923_v18 = vmov 43  }
 0x188   : > { %v448_v31 = vadd.f32 %v446_v16, %v427_v29  ;;  %v531_v34 = vsel %vm2308_vm5, 0.0, %v527_v49  ;;  %v532_v47 = vsel %vm2319_vm8, 0.0, %v528_v61  ;;  %1684 = vset.pattern.permute.xlu0 %v1923_v18  ;;  %v1925_v49 = vmov 44  }
 0x189   : > { %v537_v53 = vmul.f32 %v2288_v58, %v531_v34  ;;  %v538_v62 = vmul.f32 %v2288_v58, %v532_v47  ;;  %1685 = vset.pattern.permute.xlu1 %v1925_v49 }
 0x18a   : > { %v508_v37 = vpop.permute.xlu1 %507  ;;  %v475_v41 = vadd.f32 %v473_v30, %v448_v31 }
 0x18b   : > { %v514_v44 = vsel %vm513_vm11, %v508_v37, %v510_v36 }
 0x18c   : > { %v518_v46 = vadd.f32 %v514_v44, %v495_v38  ;;  %v496_v57 = vadd.f32 %v494_v45, %v475_v41 }
 0x18e   : > { %v539_v52 = vadd.f32 %v537_v53, %v518_v46  ;;  %v512_v54 = vpop.permute.xlu1 %511 }
 0x18f   : > { %v515_v48 = vsel %vm513_vm11, %v510_v36, %v512_v54 }
 0x190   : > { %v547_v63 = vadd.f32 %v2290_v60, %v539_v52  ;;  %v519_v0 = vadd.f32 %v515_v48, %v496_v57 }
 0x192   : > { %v540_v1 = vadd.f32 %v538_v62, %v519_v0  ;;  %v549_v56 = vmax.f32 %v547_v63, 0.0 }
 0x194   : > { %v548_v4 = vadd.f32 %v2290_v60, %v540_v1  ;;  %v2370_v6 = vsel %vm210_vm12, %v2245_v40, %v549_v56  ;;  %v1932_v56 = vmov 46  }
 0x196   : > { %v550_v5 = vmax.f32 %v548_v4, 0.0 }
 0x198   : > { %v2375_v7 = vsel %vm210_vm12, %v2240_v39, %v550_v5 }
 0x199   : > { %v553_v58 = vadd.f32 %v2375_v7, %v2370_v6 }
 0x19b   : > { %554 = vadd.xlane.f32.xlu0 %v553_v58  ;;  %v1934_v58 = vmov 49  }
 0x228   : > { %v555_v50 = vpop.xlane.xlu0 %554 }
 0x229   : > { %v556_v60 = vmul.f32 0.00390625, %v555_v50 }
 0x22b   : > { %v565_v8 = vrot.slane %v556_v60, %v2182_v24  ;;  %v575_v11 = vrot.slane %v556_v60, %v2191_v27  ;;  %v585_v13 = vrot.slane %v556_v60, %v2198_v32  ;;  %v595_v14 = vrot.slane %v556_v60, %v2205_v35 }
 0x22c   : > { %v605_v16 = vrot.slane %v556_v60, %v2212_v42  ;;  %v615_v15 = vrot.slane %v556_v60, %v2227_v55  ;;  %v625_v20 = vrot.slane %v556_v60, %v2230_v3  ;;  %v560_v51 = vrot.slane %v556_v60, %v2179_v23 }
 0x22d   : > { %v566_v10 = vmul.f32 %v565_v8, %v2144_v2  ;;  %v576_v40 = vmul.f32 %v575_v11, %v2144_v2  ;;  %v586_v39 = vmul.f32 %v585_v13, %v2144_v2  ;;  %v596_v21 = vmul.f32 %v595_v14, %v2144_v2 }
 0x22e   : > { %v606_v59 = vmul.f32 %v605_v16, %v2144_v2  ;;  %v616_v19 = vmul.f32 %v615_v15, %v2144_v2  ;;  %v626_v29 = vmul.f32 %v625_v20, %v2144_v2  ;;  %v561_v36 = vmul.f32 %v560_v51, %v2144_v2 }
 0x22f   : > { %568 = vrot.lane.b32.xlu1 %v566_v10, %s1913_s26  ;;  %v1936_v8 = vmov 22   ;;  %v1937_v10 = vmov 45   ;;  %v1938_v11 = vmov 47   ;;  %v1940_v13 = vmov 50  }
 0x233   : > { %578 = vrot.lane.b32.xlu1 %v576_v40, %s1917_s3  ;;  %v1939_v40 = vmov 48  }
 0x237   : > { %588 = vrot.lane.b32.xlu1 %v586_v39, %s1918_s4  ;;  %v1941_v39 = vmov 73  }
 0x23b   : > { %598 = vrot.lane.b32.xlu1 %v596_v21, %s1919_s5 }
 0x23f   : > { %608 = vrot.lane.b32.xlu1 %v606_v59, %s1920_s6 }
 0x243   : > { %618 = vrot.lane.b32.xlu1 %v616_v19, %s1921_s14 }
 0x247   : > { %628 = vrot.lane.b32.xlu1 %v626_v29, %s1922_s18 }
 0x24b   : > { %632 = vrot.lane.b32.xlu1 %v2144_v2, %s1924_s21  ;;  %s1927_s21 = smov 9  }
 0x2a1   : > { %v569_v30 = vpop.permute.xlu1 %568 }
 0x2a2   : > { %v571_v61 = vadd.f32 %v569_v30, %v561_v36  ;;  %v1942_v30 = vmov 18   ;;  %v1943_v36 = vmov 19  }
 0x2a5   : > { %v579_v31 = vpop.permute.xlu1 %578 }
 0x2a6   : > { %v581_v38 = vadd.f32 %v579_v31, %v571_v61  ;;  %v1944_v61 = vmov 21  }
 0x2a9   : > { %v589_v33 = vpop.permute.xlu1 %588 }
 0x2aa   : > { %v591_v41 = vadd.f32 %v589_v33, %v581_v38  ;;  %v1946_v38 = vmov 23  }
 0x2ad   : > { %v599_v34 = vpop.permute.xlu1 %598 }
 0x2ae   : > { %v601_v45 = vadd.f32 %v599_v34, %v591_v41  ;;  %v1947_v41 = vmov 24  }
 0x2b1   : > { %v609_v37 = vpop.permute.xlu1 %608 }
 0x2b2   : > { %v611_v53 = vadd.f32 %v609_v37, %v601_v45  ;;  %v1945_v37 = vmov 20  }
 0x2b5   : > { %v619_v44 = vpop.permute.xlu1 %618 }
 0x2b6   : > { %v621_v47 = vadd.f32 %v619_v44, %v611_v53 }
 0x2b9   : > { %v629_v46 = vpop.permute.xlu1 %628 }
 0x2ba   : > { %v631_v52 = vadd.f32 %v629_v46, %v621_v47 }
 0x2bd   : > { %v633_v54 = vpop.permute.xlu1 %632 }
 0x2be   : > { %v635_v57 = vadd.f32 %v633_v54, %v631_v52 }
 0x2c0   : > { %v636_v48 = vmax.f32 %v635_v57, 0.0 }
 0x2c2   : > { %v663_v62 = vrot.slane %v636_v48, %v2191_v27  ;;  %v649_v63 = vrot.slane %v636_v48, %v2182_v24  ;;  %v677_v0 = vrot.slane %v636_v48, %v2198_v32  ;;  %v691_v1 = vrot.slane %v636_v48, %v2205_v35 }
 0x2c3   : > { %v705_v4 = vrot.slane %v636_v48, %v2212_v42  ;;  %v719_v5 = vrot.slane %v636_v48, %v2227_v55  ;;  %v733_v50 = vrot.slane %v636_v48, %v2230_v3  ;;  %v640_v60 = vrot.slane %v636_v48, %v2179_v23 }
 0x2c4   : > { %665 = vrot.lane.b32.xlu1 %v663_v62, %s1926_s23  ;;  %651 = vrot.lane.b32.xlu0 %v649_v63, %s1927_s21 }
 0x2c8   : > { %679 = vrot.lane.b32.xlu1 %v677_v0, %s1928_s25  ;;  %744 = vrot.lane.b32.xlu0 %v2144_v2, %s1929_s30  ;;  %s1933_s25 = smov 14   ;;  %s2959_s30 = smov 113  }
 0x2cc   : > { %693 = vrot.lane.b32.xlu1 %v691_v1, %s1930_s17  ;;  %758 = vperm.xlu0 %1684, %v2144_v2   ;;  %s1935_s17 = smov 8  }
 0x2d0   : > { %707 = vrot.lane.b32.xlu1 %v705_v4, %s1931_s24  ;;  %1687 = vset.pattern.permute.xlu0 %v1932_v56  ;;  %s2958_s24 = smov 1  }
 0x2d1   : > { %804 = vperm.xlu0 %1687, %v2144_v2  }
 0x2d4   : > { %721 = vrot.lane.b32.xlu1 %v719_v5, %s1933_s25 }
 0x2d5   : > { %1690 = vset.pattern.permute.xlu0 %v1934_v58 }
 0x2d6   : > { %852 = vperm.xlu0 %1690, %v2144_v2  }
 0x2d8   : > { %735 = vrot.lane.b32.xlu1 %v733_v50, %s1910_s19 }
 0x2da   : > { %642 = vrot.lane.b32.xlu0 %v640_v60, %s1935_s17 }
 0x2db   : > { %1693 = vset.pattern.permute.xlu0 %v1936_v8 }
 0x2dc   : > { %772 = vperm.xlu1 %1685, %v2144_v2  }
 0x2e0   : > { %1686 = vset.pattern.permute.xlu1 %v1937_v10 }
 0x2e1   : > { %788 = vperm.xlu1 %1686, %v2144_v2  }
 0x2e5   : > { %1688 = vset.pattern.permute.xlu1 %v1938_v11 }
 0x2e6   : > { %820 = vperm.xlu1 %1688, %v2144_v2  }
 0x2ea   : > { %1689 = vset.pattern.permute.xlu1 %v1939_v40 }
 0x2eb   : > { %836 = vperm.xlu1 %1689, %v2144_v2  }
 0x2ef   : > { %1691 = vset.pattern.permute.xlu1 %v1940_v13 }
 0x2f0   : > { %868 = vperm.xlu1 %1691, %v2144_v2  }
 0x2f4   : > { %1692 = vset.pattern.permute.xlu1 %v1941_v39  ;;  %v1948_v39 = vmov 74  }
 0x2f5   : > { %884 = vperm.xlu1 %1692, %v2144_v2  }
 0x2f9   : > { %1699 = vset.pattern.permute.xlu1 %v1942_v30 }
 0x336   : > { %v666_v14 = vpop.permute.xlu1 %665  ;;  %v652_v21 = vpop.permute.xlu0 %651 }
 0x337   : > { %v668_v16 = vmul.f32 %v666_v14, %v2144_v2  ;;  %v654_v59 = vmul.f32 %v652_v21, %v2144_v2  ;;  %v1949_v21 = vmov 2  }
 0x339   : > { %656 = vrot.lane.b32.xlu1 %v654_v59, %s1913_s26  ;;  %670 = vrot.lane.b32.xlu0 %v668_v16, %s1917_s3  ;;  %v1950_v59 = vmov 3   ;;  %s2960_s3 = smov 112  }
 0x33a   : > { %v680_v15 = vpop.permute.xlu1 %679  ;;  %v2450_v53 = vpop.permute.xlu0 %744 }
 0x33b   : > { %v682_v19 = vmul.f32 %v680_v15, %v2144_v2 }
 0x33d   : > { %684 = vrot.lane.b32.xlu1 %v682_v19, %s1918_s4  ;;  %v1951_v19 = vmov 1   ;;  %s1414_s4 = scalar_lea.sflag [#allocation5], %s2128_s22 }
 0x33e   : > { %v694_v20 = vpop.permute.xlu1 %693 }
 0x33f   : > { %v696_v29 = vmul.f32 %v694_v20, %v2144_v2  ;;  %v1952_v20 = vmov 7  }
 0x341   : > { %698 = vrot.lane.b32.xlu0 %v696_v29, %s1919_s5  ;;  %v1953_v29 = vmov 6  }
 0x342   : > { %v708_v18 = vpop.permute.xlu1 %707 }
 0x343   : > { %v710_v49 = vmul.f32 %v708_v18, %v2144_v2  ;;  %v1954_v18 = vmov 25  }
 0x345   : > { %712 = vrot.lane.b32.xlu1 %v710_v49, %s1920_s6  ;;  %v1955_v49 = vmov 26   ;;  %s1971_s6 = smov [#allocation8]  }
 0x346   : > { %v722_v31 = vpop.permute.xlu1 %721 }
 0x347   : > { %v724_v33 = vmul.f32 %v722_v31, %v2144_v2 }
 0x349   : > { %1695 = vrot.lane.b32.xlu1 %v1900_v12, %s1901_s15  ;;  %726 = vrot.lane.b32.xlu0 %v724_v33, %s1921_s14  ;;  %s1819_s14 = sshll.u32 %s1971_s6, 4  ;;  %s1820_s14 = int_to_ptr.vmem [resolvable:$false] %s1819_s14 }
 0x34a   : > { %v736_v51 = vpop.permute.xlu1 %735 }
 0x34b   : > { %v738_v34 = vmul.f32 %v736_v51, %v2144_v2  ;;  %v2454_v47 = vpop.permute.xlu0 %758 }
 0x34d   : > { %740 = vrot.lane.b32.xlu1 %v738_v34, %s1922_s18  ;;  %892 = vperm.xlu0 %1693, %v2144_v2   ;;  %s1821_s18 = scalar_lea.vmem %s1820_s14, 512 }
 0x350   : > { %v2458_v54 = vpop.permute.xlu0 %804 }
 0x351   : > { %1700 = vset.pattern.permute.xlu0 %v1943_v36  ;;  %916 = vperm.xlu1 %1699, %v2144_v2  }
 0x352   : > { %924 = vperm.xlu0 %1700, %v2144_v2  }
 0x355   : > { %1712 = vset.pattern.permute.xlu1 %v1944_v61  ;;  %v2462_v48 = vpop.permute.xlu0 %852 }
 0x356   : > { %1706 = vset.pattern.permute.xlu0 %v1945_v37 }
 0x357   : > { %958 = vperm.xlu0 %1706, %v2144_v2  }
 0x359   : > { %v643_v63 = vpop.permute.xlu0 %642 }
 0x35a   : > { %v645_v0 = vmul.f32 %v643_v63, %v2144_v2 }
 0x35b   : > { %1719 = vset.pattern.permute.xlu0 %v1946_v38  ;;  %v2446_v44 = vpop.permute.xlu1 %772 }
 0x35c   : > { %1004 = vperm.xlu0 %1719, %v2144_v2  }
 0x360   : > { %1726 = vset.pattern.permute.xlu0 %v1947_v41  ;;  %v2448_v45 = vpop.permute.xlu1 %788 }
 0x361   : > { %1024 = vperm.xlu0 %1726, %v2144_v2  }
 0x365   : > { %1729 = vrot.lane.b32.xlu0 %v1900_v12, %s1915_s29  ;;  %v2452_v46 = vpop.permute.xlu1 %820 }
 0x366   : > { %1734 = vset.pattern.permute.xlu0 %v1948_v39 }
 0x369   : > { %1076 = vperm.xlu0 %1734, %v2144_v2  }
 0x36a   : > { %v2456_v52 = vpop.permute.xlu1 %836 }
 0x36d   : > { %1737 = vset.pattern.permute.xlu0 %v1949_v21  ;;  %v1961_v21 = vmov 31  }
 0x36e   : > { %1152 = vperm.xlu0 %1737, %v2144_v2  }
 0x36f   : > { %v2460_v57 = vpop.permute.xlu1 %868 }
 0x372   : > { %1739 = vset.pattern.permute.xlu0 %v1950_v59 }
 0x373   : > { %1172 = vperm.xlu0 %1739, %v2144_v2  }
 0x374   : > { %v2464_v62 = vpop.permute.xlu1 %884 }
 0x377   : > { %1143 = vrot.lane.b32.xlu0 %v2188_v26, %s1910_s19 }
 0x378   : > { %1741 = vset.pattern.permute.xlu0 %v1953_v29 }
 0x3ab   : > { %v657_v1 = vpop.permute.xlu1 %656  ;;  %v671_v56 = vpop.permute.xlu0 %670 }
 0x3ac   : > { %v659_v4 = vadd.f32 %v657_v1, %v645_v0  ;;  %v1956_v0 = vmov 8  }
 0x3ae   : > { %v673_v5 = vadd.f32 %v671_v56, %v659_v4  ;;  %v2517_v56 = vld [vmem:[#allocation6] sm:$0xff] }
 0x3af   : > { %v685_v58 = vpop.permute.xlu1 %684 }
 0x3b0   : > { %v687_v50 = vadd.f32 %v685_v58, %v673_v5  ;;  %v1957_v5 = vmov 67  }
 0x3b3   : > { %v699_v60 = vpop.permute.xlu0 %698 }
 0x3b4   : > { %v701_v8 = vadd.f32 %v699_v60, %v687_v50  ;;  %v1754_v50 = vld [vmem:[#allocation6] sm:$0xff]  ;;  %v1958_v60 = vmov 28  }
 0x3b7   : > { %v713_v10 = vpop.permute.xlu1 %712 }
 0x3b8   : > { %v715_v11 = vadd.f32 %v713_v10, %v701_v8  ;;  %v1959_v10 = vmov 4  }
 0x3bb   : > { %v727_v40 = vpop.permute.xlu0 %726  ;;  %v2492_v30 = vpop.permute.xlu1 %1695 }
 0x3bc   : > { %v2467_v13 = vadd.f32 %v727_v40, %v715_v11  ;;  %v1960_v40 = vmov 0  }
 0x3bf   : > { %v741_v31 = vpop.permute.xlu1 %740 }
 0x3c0   : > { %v743_v8 = vadd.f32 %v741_v31, %v2467_v13  ;;  %v1962_v13 = vmov 59   ;;  %v1967_v31 = vmov 30  }
 0x3c2   : > { %v747_v11 = vadd.f32 %v2450_v53, %v743_v8  ;;  %v1963_v53 = vmov 5  }
 0x3c4   : > { %v748_v39 = vmax.f32 %v747_v11, 0.0 }
 0x3c6   : > { %v749_v59 = vmin.f32 %v748_v39, 1.0  ;;  %v1755_v39 = vld [vmem:[%s2134_s28] sm:$0xff] }
 0x3cc   : > { %v2470_v14 = vpop.permute.xlu0 %892 }
 0x3d0   : > { %v2494_v33 = vpop.permute.xlu1 %916 }
 0x3d1   : > { %v2473_v16 = vpop.permute.xlu0 %924 }
 0x3d2   : > { %v927_v15 = vmul.f32 0.0, %v2473_v16 }
 0x3d4   : > { %933 = vrot.lane.b32.xlu1 %v927_v15, %s1914_s27  ;;  %v1964_v15 = vmov 27  }
 0x3d8   : > { %1702 = vrot.lane.b32.xlu1 %v1900_v12, %s1910_s19 }
 0x3dc   : > { %1708 = vrot.lane.b32.xlu1 %v1900_v12, %s2958_s24 }
 0x3e0   : > { %978 = vperm.xlu1 %1712, %v2144_v2  }
 0x3e4   : > { %1713 = vset.pattern.permute.xlu1 %v1951_v19 }
 0x3e5   : > { %1118 = vperm.xlu1 %1713, %v2144_v2  }
 0x3e9   : > { %1715 = vrot.lane.b32.xlu1 %v1900_v12, %s1913_s26 }
 0x3ea   : > { %1720 = vset.pattern.permute.xlu1 %v1952_v20 }
 0x3ed   : > { %1226 = vperm.xlu1 %1720, %v2144_v2  }
 0x3f1   : > { %1722 = vrot.lane.b32.xlu1 %v1900_v12, %s2959_s30 }
 0x3f2   : > { %1727 = vset.pattern.permute.xlu1 %v1954_v18  ;;  %v1965_v18 = vmov 29  }
 0x3f5   : > { %1032 = vperm.xlu1 %1727, %v2144_v2  }
 0x3f9   : > { %1733 = vset.pattern.permute.xlu1 %v1955_v49  ;;  %v1966_v49 = vmov 34  }
 0x446   : > { %v2496_v51 = vpop.permute.xlu1 %933 }
 0x44a   : > { %v2498_v34 = vpop.permute.xlu1 %1702 }
 0x44e   : > { %v2500_v36 = vpop.permute.xlu1 %1708 }
 0x45f   : > { %v2502_v61 = vpop.permute.xlu1 %978 }
 0x464   : > { %v1119_v12 = vpop.permute.xlu1 %1118 }
 0x465   : > { %v1122_v37 = vmul.f32 %v1119_v12, %v2185_v25  ;;  %v1121_v19 = vmul.f32 0.0, %v1119_v12  ;;  %v1123_v20 = vmul.f32 %v1119_v12, %v2188_v26  ;;  %v1969_v12 = vmov 33  }
 0x467   : > { %1129 = vrot.lane.b32.xlu0 %v1122_v37, %s1914_s27 }
 0x468   : > { %v2506_v38 = vpop.permute.xlu1 %1715 }
 0x46b   : > { %1218 = vperm.xlu0 %1741, %v2144_v2  }
 0x46c   : > { %v1227_v41 = vpop.permute.xlu1 %1226 }
 0x46d   : > { %v1229_v58 = vmul.f32 %v1227_v41, %v2185_v25  ;;  %v1230_v29 = vmul.f32 %v1227_v41, %v2188_v26 }
 0x46f   : > { %1185 = vrot.lane.b32.xlu0 %v2185_v25, %s1913_s26 }
 0x470   : > { %v2511_v63 = vpop.permute.xlu1 %1722  ;;  %1742 = vset.pattern.permute.xlu0 %v1956_v0 }
 0x473   : > { %1260 = vperm.xlu0 %1742, %v2144_v2   ;;  %v1231_v2 = vmul.f32 0.0, %v1227_v41 }
 0x474   : > { %v2514_v1 = vpop.permute.xlu1 %1032 }
 0x475   : > { %v1037_v4 = vmul.f32 0.0, %v2514_v1 }
 0x477   : > { %1743 = vset.pattern.permute.xlu0 %v1957_v5  ;;  %1045 = vrot.lane.b32.xlu1 %v1037_v4, %s2960_s3 }
 0x478   : > { %1270 = vperm.xlu0 %1743, %v2517_v56  }
 0x47b   : > { %1066 = vperm.xlu1 %1733, %v1754_v50  }
 0x47c   : > { %1235 = vrot.lane.b32.xlu0 %v1229_v58, %s2960_s3 }
 0x47d   : > { %1745 = vset.pattern.permute.xlu0 %v1958_v60 }
 0x47f   : > { %1735 = vset.pattern.permute.xlu1 %v1959_v10 }
 0x480   : > { %1239 = vrot.lane.b32.xlu0 %v1231_v2, %s2960_s3  ;;  %1086 = vperm.xlu1 %1735, %v1754_v50   ;;  %v1698_v2 = vunpack.i.h.bf16 %v2492_v30 }
 0x484   : > { %1736 = vset.pattern.permute.xlu1 %v1960_v40  ;;  %1292 = vperm.xlu0 %1745, %v2517_v56  }
 0x485   : > { %1110 = vperm.xlu1 %1736, %v1754_v50  }
 0x488   : > { %1748 = vset.pattern.permute.xlu0 %v1961_v21 }
 0x489   : > { %1099 = vrot.lane.b32.xlu1 %v2185_v25, %s1901_s15  ;;  %1340 = vperm.xlu0 %1748, %v2517_v56  }
 0x48a   : > { %1738 = vset.pattern.permute.xlu1 %v1962_v13 }
 0x48d   : > { %752 = vperm.xlu1 %1738, %v749_v59   ;;  %1751 = vset.pattern.permute.xlu0 %v1966_v49 }
 0x491   : > { %1101 = vrot.lane.b32.xlu1 %v2188_v26, %s1901_s15 }
 0x492   : > { %1740 = vset.pattern.permute.xlu1 %v1963_v53 }
 0x495   : > { %1198 = vperm.xlu1 %1740, %v1754_v50  }
 0x499   : > { %1141 = vrot.lane.b32.xlu1 %v2185_v25, %s1910_s19 }
 0x49a   : > { %1744 = vset.pattern.permute.xlu1 %v1964_v15 }
 0x49d   : > { %1127 = vrot.lane.b32.xlu1 %v1121_v19, %s1914_s27 }
 0x4a1   : > { %1131 = vrot.lane.b32.xlu1 %v1123_v20, %s1914_s27 }
 0x4a5   : > { %1161 = vrot.lane.b32.xlu1 %v2185_v25, %s2958_s24 }
 0x4a9   : > { %1163 = vrot.lane.b32.xlu1 %v2188_v26, %s2958_s24 }
 0x4ad   : > { %1187 = vrot.lane.b32.xlu1 %v2188_v26, %s1913_s26 }
 0x4b1   : > { %1205 = vrot.lane.b32.xlu1 %v2185_v25, %s2959_s30 }
 0x4b5   : > { %1207 = vrot.lane.b32.xlu1 %v2188_v26, %s2959_s30 }
 0x4b9   : > { %1247 = vrot.lane.b32.xlu1 %v2185_v25, %s1915_s29  ;;  %v1968_v25 = vmov 32  }
 0x4bd   : > { %1249 = vrot.lane.b32.xlu1 %v2188_v26, %s1915_s29  ;;  %v2557_v26 = vpop.permute.xlu0 %958 }
 0x4c1   : > { %1237 = vrot.lane.b32.xlu1 %v1230_v29, %s2960_s3  ;;  %v2559_v37 = vpop.permute.xlu0 %1004 }
 0x4c2   : > { %2961 = vst [vmem:[#allocation13_spill] sm:$0xff] %v2559_v37 }
 0x4c5   : > { %1278 = vperm.xlu1 %1744, %v2517_v56   ;;  %v2563_v0 = vpop.permute.xlu0 %1024 }
 0x4c6   : > { %2963 = vst [vmem:[#allocation15_spill] sm:$0xff] %v2563_v0 }
 0x4c9   : > { %1746 = vset.pattern.permute.xlu1 %v1965_v18  ;;  %v2567_v5 = vpop.permute.xlu0 %1729 }
 0x4ca   : > { %1308 = vperm.xlu1 %1746, %v2517_v56  }
 0x4cd   : > { %v2571_v50 = vpop.permute.xlu0 %1076 }
 0x4ce   : > { %1747 = vset.pattern.permute.xlu1 %v1967_v31  ;;  %2965 = vst [vmem:[#allocation17_spill] sm:$0xff] %v2571_v50 }
 0x4cf   : > { %1324 = vperm.xlu1 %1747, %v2517_v56  }
 0x4d1   : > { %v2575_v11 = vpop.permute.xlu0 %1152 }
 0x4d3   : > { %1749 = vset.pattern.permute.xlu1 %v1968_v25 }
 0x4d4   : > { %1356 = vperm.xlu1 %1749, %v2517_v56  }
 0x4d5   : > { %v2587_v31 = vpop.permute.xlu0 %1172 }
 0x4d8   : > { %1750 = vset.pattern.permute.xlu1 %v1969_v12 }
 0x4e9   : > { %v2561_v41 = vpop.permute.xlu1 %1045 }
 0x4ea   : > { %2962 = vst [vmem:[#allocation14_spill] sm:$0xff] %v2561_v41 }
 0x4fa   : > { %v2565_v4 = vpop.permute.xlu1 %1066 }
 0x4fb   : > { %2964 = vst [vmem:[#allocation16_spill] sm:$0xff] %v2565_v4 }
 0x4ff   : > { %v2569_v58 = vpop.permute.xlu1 %1086 }
 0x500   : > { %v1089_v21 = vmul.f32 %v1755_v39, %v2569_v58 }
 0x504   : > { %v1111_v60 = vpop.permute.xlu1 %1110 }
 0x508   : > { %v1100_v8 = vpop.permute.xlu1 %1099 }
 0x509   : > { %v1103_v10 = vsel %vm369_vm0, %v1698_v2, %v1100_v8 }
 0x50a   : > { %v1107_v40 = vsel %vm2295_vm1, 0.0, %v1103_v10 }
 0x50b   : > { %v1113_v13 = vmul.f32 %v1111_v60, %v1107_v40 }
 0x50c   : > { %v753_v59 = vpop.permute.xlu1 %752 }
 0x50d   : > { %v755_v53 = vmul.f32 %v753_v59, %v2370_v6  ;;  %v756_v15 = vmul.f32 %v753_v59, %v2375_v7  ;;  %v1115_v19 = vadd.f32 %v1113_v13, %v1089_v21 }
 0x50f   : > { %v764_v20 = vrot.slane %v755_v53, %v2179_v23  ;;  %v768_v29 = vrot.slane %v756_v15, %v2179_v23  ;;  %v778_v18 = vrot.slane %v755_v53, %v2182_v24  ;;  %v782_v49 = vrot.slane %v756_v15, %v2182_v24 }
 0x510   : > { %v794_v25 = vrot.slane %v755_v53, %v2191_v27  ;;  %v798_v12 = vrot.slane %v756_v15, %v2191_v27  ;;  %v810_v2 = vrot.slane %v755_v53, %v2198_v32  ;;  %v814_v6 = vrot.slane %v756_v15, %v2198_v32  ;;  %v1102_v7 = vpop.permute.xlu1 %1101 }
 0x511   : > { %v769_v10 = vmul.f32 %v764_v20, %v2454_v47  ;;  %v770_v40 = vmul.f32 %v768_v29, %v2454_v47  ;;  %v783_v39 = vmul.f32 %v778_v18, %v2446_v44  ;;  %v784_v21 = vmul.f32 %v782_v49, %v2446_v44  ;;  %v1144_v49 = vpop.permute.xlu0 %1143 }
 0x512   : > { %v799_v13 = vmul.f32 %v794_v25, %v2448_v45  ;;  %v800_v59 = vmul.f32 %v798_v12, %v2448_v45  ;;  %v826_v4 = vrot.slane %v755_v53, %v2205_v35  ;;  %v830_v41 = vrot.slane %v756_v15, %v2205_v35 }
 0x513   : > { %v785_v22 = vadd.f32 %v783_v39, %v769_v10  ;;  %v786_v50 = vadd.f32 %v784_v21, %v770_v40  ;;  %v815_v0 = vmul.f32 %v810_v2, %v2458_v54  ;;  %v842_v20 = vrot.slane %v755_v53, %v2212_v42 }
 0x514   : > { %v2603_v37 = vpop.permute.xlu1 %1198  ;;  %v816_v44 = vmul.f32 %v814_v6, %v2458_v54  ;;  %v846_v18 = vrot.slane %v756_v15, %v2212_v42  ;;  %v858_v45 = vrot.slane %v755_v53, %v2227_v55  ;;  %v862_v25 = vrot.slane %v756_v15, %v2227_v55 }
 0x515   : > { %v801_v47 = vadd.f32 %v799_v13, %v785_v22  ;;  %v802_v29 = vadd.f32 %v800_v59, %v786_v50  ;;  %v831_v40 = vmul.f32 %v826_v4, %v2452_v46  ;;  %v832_v2 = vmul.f32 %v830_v41, %v2452_v46 }
 0x516   : > { %v1705_v39 = vunpack.i.h.bf16 %v2498_v34  ;;  %v847_v22 = vmul.f32 %v842_v20, %v2456_v52  ;;  %v874_v50 = vrot.slane %v755_v53, %v2230_v3  ;;  %v1104_v54 = vsel %vm369_vm0, %v1100_v8, %v1102_v7  ;;  %v1130_v7 = vpop.permute.xlu0 %1129 }
 0x517   : > { %v817_v12 = vadd.f32 %v815_v0, %v801_v47  ;;  %v818_v10 = vadd.f32 %v816_v44, %v802_v29  ;;  %v848_v59 = vmul.f32 %v846_v18, %v2456_v52  ;;  %v878_v0 = vrot.slane %v756_v15, %v2230_v3  ;;  %v1756_v44 = vld [vmem:[%s2134_s28 + $0x8] sm:$0xff]  ;;  %s1525_s28 = sshll.u32 %s2008_s13, 8 }
 0x518   : > { %v1142_v6 = vpop.permute.xlu1 %1141  ;;  %v863_v4 = vmul.f32 %v858_v45, %v2462_v48  ;;  %v864_v46 = vmul.f32 %v862_v25, %v2462_v48  ;;  %v1108_v41 = vsel %vm2302_vm4, 0.0, %v1104_v54  ;;  %v1090_v52 = vmul.f32 %v1756_v44, %v2569_v58  ;;  %s2871_s13 = scalar_lea.hbm %s2917_s2, %s1525_s28 }
 0x519   : > { %v833_v21 = vadd.f32 %v831_v40, %v817_v12  ;;  %v834_v13 = vadd.f32 %v832_v2, %v818_v10  ;;  %v1145_v20 = vsel %vm413_vm2, %v1705_v39, %v1142_v6  ;;  %v1114_v29 = vmul.f32 %v1111_v60, %v1108_v41 }
 0x51a   : > { %v1149_v8 = vsel %vm2308_vm5, 0.0, %v1145_v20  ;;  %v879_v15 = vmul.f32 %v874_v50, %v2460_v57  ;;  %v880_v25 = vmul.f32 %v878_v0, %v2460_v57  ;;  %v2636_v50 = vpop.permute.xlu0 %1218  ;;  %v1711_v57 = vunpack.i.h.bf16 %v2500_v36 }
 0x51b   : > { %v849_v53 = vadd.f32 %v847_v22, %v833_v21  ;;  %v850_v47 = vadd.f32 %v848_v59, %v834_v13  ;;  %v1155_v10 = vmul.f32 %v2575_v11, %v1149_v8  ;;  %v1116_v60 = vadd.f32 %v1114_v29, %v1090_v52 }
 0x51c   : > { %v1128_v18 = vpop.permute.xlu1 %1127  ;;  %v1146_v13 = vsel %vm413_vm2, %v1142_v6, %v1144_v49  ;;  %v1718_v8 = vunpack.i.h.bf16 %v2506_v38 }
 0x51d   : > { %v865_v45 = vadd.f32 %v863_v4, %v849_v53  ;;  %v866_v48 = vadd.f32 %v864_v46, %v850_v47  ;;  %v1133_v12 = vsel %vm400_vm3, %v1128_v18, %v1130_v7  ;;  %v1150_v0 = vsel %vm2319_vm8, 0.0, %v1146_v13 }
 0x51e   : > { %v1137_v40 = vadd.f32 %v1133_v12, %v1115_v19  ;;  %v1186_v49 = vpop.permute.xlu0 %1185  ;;  %v1156_v41 = vmul.f32 %v2575_v11, %v1150_v0 }
 0x51f   : > { %v881_v2 = vadd.f32 %v879_v15, %v865_v45  ;;  %v882_v39 = vadd.f32 %v880_v25, %v866_v48 }
 0x520   : > { %v1157_v22 = vadd.f32 %v1155_v10, %v1137_v40  ;;  %v1132_v54 = vpop.permute.xlu1 %1131 }
 0x521   : > { %v2631_v21 = vadd.f32 %v2464_v62, %v881_v2  ;;  %v2634_v58 = vadd.f32 %v2464_v62, %v882_v39  ;;  %v1134_v62 = vsel %vm400_vm3, %v1130_v7, %v1132_v54  ;;  %v1725_v2 = vunpack.i.h.bf16 %v2511_v63 }
 0x522   : > { %v1138_v20 = vadd.f32 %v1134_v62, %v1116_v60  ;;  %v2667_v18 = vpop.permute.xlu0 %1260 }
 0x523   : > { %907 = vrot.lane.b32.xlu0 %v2634_v58, %s1901_s15  ;;  %905 = vrot.lane.b32.xlu1 %v2631_v21, %s1901_s15  ;;  %v928_v54 = vmul.f32 %v2473_v16, %v2631_v21  ;;  %s2971_s15 = sshll.u32 %s2128_s22, 4 }
 0x524   : > { %v1162_v19 = vpop.permute.xlu1 %1161  ;;  %v1158_v52 = vadd.f32 %v1156_v41, %v1138_v20 }
 0x525   : > { %v1165_v59 = vsel %vm434_vm6, %v1711_v57, %v1162_v19 }
 0x526   : > { %v1169_v4 = vsel %vm2295_vm1, 0.0, %v1165_v59  ;;  %v2684_v39 = vpop.permute.xlu0 %1270  ;;  %v1732_v59 = vunpack.i.h.bf16 %v2567_v5 }
 0x527   : > { %v1175_v46 = vmul.f32 %v2587_v31, %v1169_v4  ;;  %947 = vrot.lane.b32.xlu0 %v2631_v21, %s1910_s19  ;;  %949 = vrot.lane.b32.xlu1 %v2634_v58, %s1910_s19  ;;  %s172_s19 = scalar_lea.vmem [#allocation8], %s2971_s15 }
 0x528   : > { %v1164_v6 = vpop.permute.xlu1 %1163 }
 0x529   : > { %v1177_v53 = vadd.f32 %v1175_v46, %v1157_v22  ;;  %v1166_v47 = vsel %vm434_vm6, %v1162_v19, %v1164_v6  ;;  %v1035_v6 = vmul.f32 %v2514_v1, %v2631_v21 }
 0x52a   : > { %v1170_v29 = vsel %vm2302_vm4, 0.0, %v1166_v47  ;;  %v1236_v62 = vpop.permute.xlu0 %1235 }
 0x52b   : > { %v1176_v7 = vmul.f32 %v2587_v31, %v1170_v29  ;;  %969 = vrot.lane.b32.xlu0 %v2634_v58, %s2958_s24  ;;  %967 = vrot.lane.b32.xlu1 %v2631_v21, %s2958_s24  ;;  %v1970_v29 = vmov 68  }
 0x52c   : > { %v1188_v44 = vpop.permute.xlu1 %1187 }
 0x52d   : > { %v1191_v11 = vsel %vm461_vm9, %v1186_v49, %v1188_v44  ;;  %v1192_v15 = vsel %vm461_vm9, %v1188_v44, %v1718_v8  ;;  %v1178_v48 = vadd.f32 %v1176_v7, %v1158_v52  ;;  %v929_v49 = vmul.f32 %v2473_v16, %v2634_v58 }
 0x52e   : > { %v1195_v45 = vsel %vm2308_vm5, 0.0, %v1191_v11  ;;  %v1196_v31 = vsel %vm2319_vm8, 0.0, %v1192_v15  ;;  %v1240_v20 = vpop.permute.xlu0 %1239  ;;  %v1036_v16 = vmul.f32 %v2514_v1, %v2634_v58 }
 0x52f   : > { %v1201_v25 = vmul.f32 %v2603_v37, %v1195_v45  ;;  %v1202_v12 = vmul.f32 %v2603_v37, %v1196_v31  ;;  %991 = vrot.lane.b32.xlu0 %v2631_v21, %s1913_s26  ;;  %1011 = vrot.lane.b32.xlu1 %v2631_v21, %s2959_s30 }
 0x530   : > { %v1206_v10 = vpop.permute.xlu1 %1205 }
 0x531   : > { %v1203_v40 = vadd.f32 %v1201_v25, %v1177_v53  ;;  %v1204_v60 = vadd.f32 %v1202_v12, %v1178_v48 }
 0x532   : > { %v2719_v15 = vpop.permute.xlu0 %1292 }
 0x533   : > { %993 = vrot.lane.b32.xlu0 %v2634_v58, %s1913_s26  ;;  %1055 = vrot.lane.b32.xlu1 %v2634_v58, %s1915_s29  ;;  %s1428_s26 = sshll.u32 %s172_s19, 4  ;;  %s2873_s26 = int_to_ptr.vmem [resolvable:$true] %s1428_s26 }
 0x534   : > { %v1208_v37 = vpop.permute.xlu1 %1207  ;;  %s1815_s5 = scalar_lea.vmem %s2873_s26, 256  ;;  %p1822_p13 = scmp.lt.s32.totalorder %s2873_s26, %s1820_s14 }
 0x535   : > { %v1212_v22 = vsel %vm482_vm7, %v1208_v37, %v1725_v2  ;;  %v1211_v31 = vsel %vm482_vm7, %v1206_v10, %v1208_v37  ;;  %p1816_p6 = scmp.ne.s32.totalorder %s2873_s26, %s1815_s5  ;;  %p1823_p0 = scmp.lt.s32.totalorder %s1821_s18, %s1815_s5 }
 0x536   : > { %v1216_v57 = vsel %vm2302_vm4, 0.0, %v1212_v22  ;;  %v2724_v1 = vpop.permute.xlu0 %1340  ;;  %v1215_v25 = vsel %vm2295_vm1, 0.0, %v1211_v31 }
 0x537   : > { %v1222_v13 = vmul.f32 %v2636_v50, %v1216_v57  ;;  %1013 = vrot.lane.b32.xlu0 %v2634_v58, %s2959_s30  ;;  %935 = vrot.lane.b32.xlu1 %v928_v54, %s1914_s27  ;;  %p1817_p9 = pnand %p1816_p6, %p2079_p8  ;;  %p1824_p5 = por %p1823_p0, %p1822_p13 }
 0x538   : > { %v1248_v19 = vpop.permute.xlu1 %1247 }
 0x539   : > { %v1224_v0 = vadd.f32 %v1222_v13, %v1204_v60  ;;  %p1818_p12 = pneg %p1817_p9 }
 0x53b   : > { %1053 = vrot.lane.b32.xlu0 %v2631_v21, %s1915_s29  ;;  %1372 = vperm.xlu1 %1750, %v2517_v56   ;;  %p1825_p10 = pnand %p1824_p5, %p1818_p12 }
 0x53c   : > { %v1250_v4 = vpop.permute.xlu1 %1249 }
 0x53d   : > { %v1254_v46 = vsel %vm526_vm10, %v1250_v4, %v1732_v59  ;;  %v1253_v12 = vsel %vm526_vm10, %v1248_v19, %v1250_v4 }
 0x53e   : > { %v1258_v41 = vsel %vm2319_vm8, 0.0, %v1254_v46  ;;  %v1257_v22 = vsel %vm2308_vm5, 0.0, %v1253_v12 }
 0x53f   : > { %937 = vrot.lane.b32.xlu0 %v929_v49, %s1914_s27  ;;  %1041 = vrot.lane.b32.xlu1 %v1035_v6, %s2960_s3  ;;  %v1264_v53 = vmul.f32 %v2667_v18, %v1258_v41  ;;  %v1263_v13 = vmul.f32 %v2667_v18, %v1257_v22 }
 0x540   : > { %v1238_v47 = vpop.permute.xlu1 %1237  ;;  %1752 = vset.pattern.permute.xlu1 %v1970_v29 }
 0x541   : > { %v1242_v8 = vsel %vm513_vm11, %v1238_v47, %v1240_v20  ;;  %v1241_v54 = vsel %vm513_vm11, %v1236_v62, %v1238_v47  ;;  %v1710_v20 = vunpack.i.l.bf16 %v2500_v36 }
 0x542   : > { %v1246_v7 = vadd.f32 %v1242_v8, %v1224_v0  ;;  %v1697_v0 = vunpack.i.l.bf16 %v2492_v30 }
 0x543   : > { %1043 = vrot.lane.b32.xlu0 %v1036_v16, %s2960_s3  ;;  %1404 = vperm.xlu1 %1752, %v2517_v56  }
 0x544   : > { %v1266_v44 = vadd.f32 %v1264_v53, %v1246_v7  ;;  %v2715_v52 = vpop.permute.xlu1 %1278 }
 0x546   : > { %v1274_v18 = vadd.f32 %v2684_v39, %v1266_v44 }
 0x547   : > { %1388 = vperm.xlu0 %1751, %v2517_v56   ;;  %v1221_v56 = vmul.f32 %v2636_v50, %v1215_v25 }
 0x548   : > { %v2756_v31 = vmax.f32 %v1274_v18, 0.0 }
 0x549   : > { %v2717_v11 = vpop.permute.xlu1 %1308  ;;  %v1223_v57 = vadd.f32 %v1221_v56, %v1203_v40  ;;  %v1704_v40 = vunpack.i.l.bf16 %v2498_v34  ;;  %v895_v34 = vmul.f32 %v2470_v14, %v2631_v21 }
 0x54b   : > { %1753 = vset.pattern.permute.xlu0 %v1970_v29  ;;  %v1245_v59 = vadd.f32 %v1241_v54, %v1223_v57  ;;  %v1288_v57 = vrot.slane %v2756_v31, %v2179_v23 }
 0x54d   : > { %v1265_v50 = vadd.f32 %v1263_v13, %v1245_v59  ;;  %v1302_v59 = vrot.slane %v2756_v31, %v2182_v24 }
 0x54e   : > { %v2721_v45 = vpop.permute.xlu1 %1324 }
 0x54f   : > { %v1273_v62 = vadd.f32 %v2684_v39, %v1265_v50 }
 0x551   : > { %v2750_v8 = vmax.f32 %v1273_v62, 0.0 }
 0x553   : > { %v2726_v48 = vpop.permute.xlu1 %1356  ;;  %v1298_v13 = vrot.slane %v2750_v8, %v2182_v24  ;;  %v1290_v24 = vmul.f32 %v1288_v57, %v2715_v52 }
 0x595   : > { %v906_v60 = vpop.permute.xlu1 %905  ;;  %v908_v2 = vpop.permute.xlu0 %907 }
 0x596   : > { %v909_v19 = vsel %vm369_vm0, %v1697_v0, %v906_v60  ;;  %v910_v16 = vsel %vm369_vm0, %v906_v60, %v908_v2  ;;  %v1284_v2 = vrot.slane %v2750_v8, %v2179_v23 }
 0x597   : > { %v913_v41 = vsel %vm2295_vm1, 0.0, %v909_v19  ;;  %v914_v56 = vsel %vm2302_vm4, 0.0, %v910_v16 }
 0x598   : > { %v919_v30 = vmul.f32 %v2494_v33, %v913_v41  ;;  %v920_v0 = vmul.f32 %v2494_v33, %v914_v56  ;;  %v1289_v62 = vmul.f32 %v1284_v2, %v2715_v52  ;;  %v1303_v33 = vmul.f32 %v1298_v13, %v2719_v15 }
 0x599   : > { %v950_v10 = vpop.permute.xlu1 %949  ;;  %v948_v37 = vpop.permute.xlu0 %947 }
 0x59a   : > { %v951_v53 = vsel %vm413_vm2, %v1704_v40, %v948_v37  ;;  %v921_v39 = vadd.f32 %v919_v30, %v895_v34  ;;  %v952_v50 = vsel %vm413_vm2, %v948_v37, %v950_v10  ;;  %v1717_v40 = vunpack.i.l.bf16 %v2506_v38 }
 0x59b   : > { %v955_v36 = vsel %vm2308_vm5, 0.0, %v951_v53  ;;  %v1304_v10 = vmul.f32 %v1302_v59, %v2719_v15  ;;  %v956_v37 = vsel %vm2319_vm8, 0.0, %v952_v50  ;;  %v1724_v30 = vunpack.i.l.bf16 %v2511_v63 }
 0x59c   : > { %v961_v22 = vmul.f32 %v2557_v26, %v955_v36  ;;  %v1314_v38 = vrot.slane %v2750_v8, %v2191_v27  ;;  %v1731_v36 = vunpack.i.l.bf16 %v2567_v5 }
 0x59d   : > { %v968_v46 = vpop.permute.xlu1 %967  ;;  %v970_v49 = vpop.permute.xlu0 %969  ;;  %v1306_v56 = vadd.f32 %v1304_v10, %v1290_v24  ;;  %v2968_v10 = vld [vmem:[#allocation14_spill] sm:$0xff] }
 0x59e   : > { %v971_v7 = vsel %vm434_vm6, %v1710_v20, %v968_v46  ;;  %v972_v23 = vsel %vm434_vm6, %v968_v46, %v970_v49  ;;  %v896_v20 = vmul.f32 %v2470_v14, %v2634_v58  ;;  %v1318_v14 = vrot.slane %v2756_v31, %v2191_v27 }
 0x59f   : > { %v975_v12 = vsel %vm2295_vm1, 0.0, %v971_v7  ;;  %v976_v52 = vsel %vm2302_vm4, 0.0, %v972_v23  ;;  %v962_v7 = vmul.f32 %v2557_v26, %v956_v37  ;;  %v1319_v27 = vmul.f32 %v1314_v38, %v2717_v11 }
 0x5a0   : > { %v922_v49 = vadd.f32 %v920_v0, %v896_v20  ;;  %v1320_v26 = vmul.f32 %v1318_v14, %v2717_v11 }
 0x5a1   : > { %v2738_v4 = vpop.permute.xlu1 %1011  ;;  %v992_v6 = vpop.permute.xlu0 %991 }
 0x5a2   : > { %v1322_v11 = vadd.f32 %v1320_v26, %v1306_v56 }
 0x5a5   : > { %v2748_v47 = vpop.permute.xlu1 %1055  ;;  %v994_v29 = vpop.permute.xlu0 %993 }
 0x5a6   : > { %v998_v46 = vsel %vm461_vm9, %v994_v29, %v1717_v40  ;;  %v997_v15 = vsel %vm461_vm9, %v992_v6, %v994_v29  ;;  %v1346_v40 = vrot.slane %v2750_v8, %v2205_v35 }
 0x5a7   : > { %v1001_v6 = vsel %vm2308_vm5, 0.0, %v997_v15 }
 0x5a9   : > { %v936_v44 = vpop.permute.xlu1 %935  ;;  %v1014_v25 = vpop.permute.xlu0 %1013 }
 0x5aa   : > { %v939_v60 = vsel %vm400_vm3, %v2496_v51, %v936_v44  ;;  %v981_v51 = vmul.f32 %v2502_v61, %v975_v12  ;;  %v1018_v63 = vsel %vm482_vm7, %v1014_v25, %v1724_v30  ;;  %v1002_v12 = vsel %vm2319_vm8, 0.0, %v998_v46  ;;  %v2969_v46 = vld [vmem:[#allocation16_spill] sm:$0xff] }
 0x5ab   : > { %v943_v54 = vadd.f32 %v939_v60, %v921_v39  ;;  %v1305_v39 = vadd.f32 %v1303_v33, %v1289_v62  ;;  %v982_v60 = vmul.f32 %v2502_v61, %v976_v52  ;;  %v1017_v5 = vsel %vm482_vm7, %v2738_v4, %v1014_v25  ;;  %v2967_v25 = vld [vmem:[#allocation15_spill] sm:$0xff] }
 0x5ac   : > { %v1022_v2 = vsel %vm2302_vm4, 0.0, %v1018_v63  ;;  %v1060_v61 = vsel %vm526_vm10, %v2748_v47, %v1731_v36  ;;  %v1021_v17 = vsel %vm2295_vm1, 0.0, %v1017_v5  ;;  %v1350_v62 = vrot.slane %v2756_v31, %v2205_v35 }
 0x5ad   : > { %v963_v19 = vadd.f32 %v961_v22, %v943_v54  ;;  %v1054_v41 = vpop.permute.xlu0 %1053  ;;  %v1334_v22 = vrot.slane %v2756_v31, %v2198_v32  ;;  %v2966_v54 = vld [vmem:[#allocation13_spill] sm:$0xff]  ;;  %v1321_v59 = vadd.f32 %v1319_v27, %v1305_v39  ;;  %v1064_v23 = vsel %vm2319_vm8, 0.0, %v1060_v61 }
 0x5ae   : > { %v1008_v57 = vmul.f32 %v2966_v54, %v1002_v12  ;;  %v1007_v50 = vmul.f32 %v2966_v54, %v1001_v6  ;;  %v1059_v9 = vsel %vm526_vm10, %v1054_v41, %v2748_v47  ;;  %v1351_v35 = vmul.f32 %v1346_v40, %v2724_v1 }
 0x5af   : > { %v983_v18 = vadd.f32 %v981_v51, %v963_v19  ;;  %v1336_v4 = vmul.f32 %v1334_v22, %v2721_v45  ;;  %v1028_v51 = vmul.f32 %v2967_v25, %v1022_v2  ;;  %v1352_v43 = vmul.f32 %v1350_v62, %v2724_v1  ;;  %v2970_v22 = vld [vmem:[#allocation17_spill] sm:$0xff] }
 0x5b0   : > { %v1366_v47 = vrot.slane %v2756_v31, %v2212_v42  ;;  %v1063_v41 = vsel %vm2308_vm5, 0.0, %v1059_v9  ;;  %v1382_v1 = vrot.slane %v2756_v31, %v2227_v55 }
 0x5b1   : > { %v938_v53 = vpop.permute.xlu0 %937  ;;  %v1009_v24 = vadd.f32 %v1007_v50, %v983_v18  ;;  %v1338_v38 = vadd.f32 %v1336_v4, %v1322_v11  ;;  %v1362_v18 = vrot.slane %v2750_v8, %v2212_v42  ;;  %v1069_v42 = vmul.f32 %v2969_v46, %v1063_v41 }
 0x5b2   : > { %v940_v16 = vsel %vm400_vm3, %v936_v44, %v938_v53  ;;  %v1330_v44 = vrot.slane %v2750_v8, %v2198_v32  ;;  %v1368_v56 = vmul.f32 %v1366_v47, %v2726_v48 }
 0x5b3   : > { %v944_v34 = vadd.f32 %v940_v16, %v922_v49  ;;  %v1070_v49 = vmul.f32 %v2969_v46, %v1064_v23  ;;  %v1354_v36 = vadd.f32 %v1352_v43, %v1338_v38  ;;  %v1367_v39 = vmul.f32 %v1362_v18, %v2726_v48 }
 0x5b4   : > { %v1335_v0 = vmul.f32 %v1330_v44, %v2721_v45  ;;  %v1027_v45 = vmul.f32 %v2967_v25, %v1021_v17 }
 0x5b5   : > { %v964_v29 = vadd.f32 %v962_v7, %v944_v34  ;;  %v1044_v19 = vpop.permute.xlu0 %1043  ;;  %v1378_v7 = vrot.slane %v2750_v8, %v2227_v55  ;;  %v1370_v6 = vadd.f32 %v1368_v56, %v1354_v36  ;;  %v1398_v55 = vrot.slane %v2756_v31, %v2230_v3 }
 0x5b6   : > { %v1048_v37 = vsel %vm513_vm11, %v1044_v19, %v2968_v10  ;;  %v1337_v30 = vadd.f32 %v1335_v0, %v1321_v59  ;;  %v1029_v52 = vadd.f32 %v1027_v45, %v1009_v24 }
 0x5b7   : > { %v984_v13 = vadd.f32 %v982_v60, %v964_v29  ;;  %v1394_v29 = vrot.slane %v2750_v8, %v2230_v3 }
 0x5b8   : > { %v1353_v34 = vadd.f32 %v1351_v35, %v1337_v30 }
 0x5b9   : > { %v1010_v32 = vadd.f32 %v1008_v57, %v984_v13 }
 0x5ba   : > { %v1373_v20 = vpop.permute.xlu1 %1372  ;;  %v1369_v60 = vadd.f32 %v1367_v39, %v1353_v34 }
 0x5bb   : > { %v1030_v33 = vadd.f32 %v1028_v51, %v1010_v32  ;;  %v1383_v28 = vmul.f32 %v1378_v7, %v1373_v20  ;;  %v1384_v12 = vmul.f32 %v1382_v1, %v1373_v20 }
 0x5bd   : > { %v1052_v53 = vadd.f32 %v1048_v37, %v1030_v33  ;;  %v1385_v44 = vadd.f32 %v1383_v28, %v1369_v60  ;;  %v1386_v5 = vadd.f32 %v1384_v12, %v1370_v6 }
 0x5be   : > { %v1042_v14 = vpop.permute.xlu1 %1041 }
 0x5bf   : > { %v1072_v15 = vadd.f32 %v1070_v49, %v1052_v53  ;;  %v1047_v16 = vsel %vm513_vm11, %v1042_v14, %v1044_v19 }
 0x5c0   : > { %v1051_v63 = vadd.f32 %v1047_v16, %v1029_v52 }
 0x5c1   : > { %v1080_v61 = vadd.f32 %v2970_v22, %v1072_v15 }
 0x5c2   : > { %v1071_v27 = vadd.f32 %v1069_v42, %v1051_v63  ;;  %v1405_v57 = vpop.permute.xlu1 %1404 }
 0x5c3   : > { %v1082_v0 = vsel %vm210_vm12, %v2634_v58, %v1080_v61 }
 0x5c4   : > { %v1079_v54 = vadd.f32 %v2970_v22, %v1071_v27 }
 0x5c6   : > { %v1389_v26 = vpop.permute.xlu0 %1388  ;;  %v1081_v11 = vsel %vm210_vm12, %v2631_v21, %v1079_v54 }
 0x5c7   : > { %v1399_v2 = vmul.f32 %v1394_v29, %v1389_v26  ;;  %v1400_v48 = vmul.f32 %v1398_v55, %v1389_v26 }
 0x5c9   : > { %v1401_v13 = vadd.f32 %v1399_v2, %v1385_v44  ;;  %v1402_v59 = vadd.f32 %v1400_v48, %v1386_v5 }
 0x5cb   : > { %v1407_v8 = vadd.f32 %v1405_v57, %v1401_v13  ;;  %v1408_v3 = vadd.f32 %v1405_v57, %v1402_v59 }
 0x5cd   : > { %v1409_v50 = vadd.f32 %v1407_v8, %v1081_v11  ;;  %v1410_v4 = vadd.f32 %v1408_v3, %v1082_v0 }
 0x5cf   : > { %1411 = vst [vmem:[%s172_s19] sm:$0xff] %v1409_v50  ;;  %1412 = vst [vmem:[%s172_s19 + $0x8] sm:$0xff] %v1410_v4 }
 0x5d0   : > { %1828 = shalt.err (!%p1825_p10)
}
 0x5d1   : > { %s1829_s22 = scalar_lea.hbm %s2871_s13, 256  ;;  %s1833_s25 = scalar_lea.hbm %s2917_s2, 512 }
 0x5d2   : > { %p1830_p1 = scmp.ne.s32.totalorder %s2871_s13, %s1829_s22  ;;  %p1834_p3 = scmp.lt.u32.totalorder %s2871_s13, %s2917_s2 }
 0x5d3   : > { %p1835_p11 = scmp.lt.u32.totalorder %s1833_s25, %s1829_s22  ;;  %p1837_p6 = scmp.lt.u32.totalorder %s1829_s22, %s2871_s13 }
 0x5d4   : > { %p1831_p2 = pnand %p1830_p1, %p2079_p8 }
 0x5d5   : > { %p1836_p4 = por %p1835_p11, %p1834_p3 }
 0x5d6   : > { %p1832_p7 = pneg %p1831_p2 }
 0x5d7   : > { %p1838_p9 = por %p1837_p6, %p1836_p4 }
 0x5d9   : > { %p1839_p12 = pnand %p1838_p9, %p1832_p7 }
 0x5db   : > { %1842 = shalt.err (!%p1839_p12)
}
 0x5dc   : > { %1532 = dma.vmem_to_hbm [thread:$0]  (%p2079_p8), %s2873_s26, 256, %s2871_s13, %s1414_s4  }
 0x5dd PF: > { %s1440_s30 = sand.u32 1, %s1873_s9   ;;  %p2973_p13 = scmp.ne.s32.totalorder %s2935_s16, 0 }
 0x5de   : > { %p2974_p0 = scmp.ge.s32.totalorder %s1885_s12, 2  ;;  %s1441_s3 = scalar_lea.sflag [#allocation5], %s1440_s30 }
 0x5e0   : > { %p1543_p5 = pnand %p2974_p0, %p2973_p13 }
 0x5e2   : > { %1868 = dma.done.wait (!%p1543_p5), %s1441_s3, 256  }
 0x5e3   : > { %1870 = vsyncadd (!%p1543_p5), %s1441_s3, 4294967040  ;;  %p16_p10 = scmp.ge.s32.totalorder %s2035_s20, 4   ;;  %s2975_s9 = smov %s1877_s10 }
 0x5e4   : > { %s2976_s10 = smov %s1881_s11  ;;  %s2977_s11 = smov %s2071_s7 }
 0x5e5   : > { %s2978_s12 = smov %s2035_s20  ;;  %18 = sbr.rel (!%p16_p10) target bundleno = 6 (0x6), region = 77 }
 0x5ec   :  { %1446 = vsyncpa [#allocation4], 1 }
 0x5ed   :  { %1448 = vsyncpa [#allocation4 + $0x1], 1 }
 0x5ee   :  { %1449 = vsyncpa [#allocation7], 1 }
 0x5ef   :  { %1450 = vsyncpa [#allocation5], 1 }
 0x5f0   :  { %1452 = vsyncpa [#allocation5 + $0x1], 1 }

</bundles_post_ra>
